<compile_context>
chip_gen: v5e
topology: v5e:2x2
jax: 0.10.0
libtpu: 0.0.40
codegen_flags: <defaults>
</compile_context>

<pallas_src>
import jax
import jax.numpy as jnp
from jax.experimental import pallas as pl
from jax.experimental.pallas import tpu as pltpu

HIDDEN = 768


def _linear_kernel(x_ref, w_ref, b_ref, o_ref):
    # bf16 x bf16 MXU matmul with f32 accumulation, fused f32 bias add, f32 store.
    x_bf = x_ref[...].astype(jnp.bfloat16)
    acc = jnp.dot(x_bf, w_ref[...], preferred_element_type=jnp.float32)
    o_ref[...] = (acc + b_ref[...]).astype(o_ref.dtype)


def _spec(block_shape, index_map, buffers=None):
    """BlockSpec with an optional explicit buffer depth (falls back if unsupported)."""
    if buffers is not None and hasattr(pl, "Buffered"):
        try:
            return pl.BlockSpec(block_shape, index_map,
                                pipeline_mode=pl.Buffered(buffers))
        except TypeError:
            pass
    return pl.BlockSpec(block_shape, index_map)


def _auto_n_split():
    """Split the output-feature axis across TensorCores only on 2-TC chips (v7x)."""
    try:
        kind = jax.devices()[0].device_kind.lower()
    except Exception:
        return 1
    return 2 if ("v7" in kind or "7x" in kind) else 1


def prepare_params(weight, bias):
    """One-time param prep (do NOT call per forward pass).

    weight: (out_features, in_features)  -- PyTorch nn.Linear convention
    Returns weight pre-transposed to (in, out) layout AND cast to bf16 (MXU-native),
    and bias as an f32 (1, N) row, so the per-call path does no HBM transpose/cast.
    """
    w_t = weight.T.astype(jnp.bfloat16)
    bias_row = bias.reshape(1, -1).astype(jnp.float32)
    return w_t, bias_row


def linear_project(x, w_t, bias_row, *, tm_max=512, n_split=None):
    """y = x @ w_t + bias  (== nn.Linear(x) with w_t = weight.T, bf16 weights).

    x:        [..., in_features]   (f32)
    w_t:      [in_features, out_features]  bf16, pre-transposed via prepare_params
    bias_row: [1, out_features]    f32
    """
    orig_shape = x.shape
    K = orig_shape[-1]
    N = w_t.shape[1]

    x2d = x.reshape(-1, K)
    M = x2d.shape[0]

    if n_split is None:
        n_split = _auto_n_split()
    if n_split < 1 or N % (128 * n_split) != 0:
        n_split = 1
    tn = N // n_split                      # 768 or 384 (both lane-dense multiples of 128)

    # Row tiling: full-extent block for small M (exactly one step per core), else
    # tm=512 (multiple of 8).  VMEM per step with bf16 W single-buffered:
    #   x 512x768 f32 (1.5 MiB) x up to 3 bufs + W 768x768 bf16 (1.125 MiB) x 1
    #   + out 512x768 f32 (1.5 MiB) x 2  ~= 9 MiB  -- under every generation's scoped
    #   default (v5e 16 MiB, v6e 32 MiB, v7x 32 MiB scoped / 64 MiB physical).
    tm = M if M <= tm_max else tm_max
    grid_m = pl.cdiv(M, tm)                # tail block (if any) is masked, not dropped
    grid = (grid_m, n_split)

    # Deepen the x pipeline only when the row axis is actually tiled.
    x_buffers = 3 if grid_m > 1 else None

    bytes_accessed = (
        x2d.size * x2d.dtype.itemsize          # x read (f32)
        + w_t.size * w_t.dtype.itemsize        # weight read (bf16)
        + bias_row.size * bias_row.dtype.itemsize
        + M * N * jnp.dtype(x.dtype).itemsize  # output write (f32)
    )
    cost = pl.CostEstimate(
        flops=2 * M * K * N,
        transcendentals=0,
        bytes_accessed=int(bytes_accessed),
    )

    out2d = pl.pallas_call(
        _linear_kernel,
        out_shape=jax.ShapeDtypeStruct((M, N), x.dtype),
        grid_spec=pltpu.PrefetchScalarGridSpec(
            num_scalar_prefetch=0,
            grid=grid,
            in_specs=[
                _spec((tm, K), lambda i, j: (i, 0), buffers=x_buffers),  # x rows, full K
                _spec((K, tn), lambda i, j: (0, j), buffers=1),          # resident W^T slab
                _spec((1, tn), lambda i, j: (0, j), buffers=1),          # resident bias row
            ],
            out_specs=pl.BlockSpec((tm, tn), lambda i, j: (i, j)),
        ),
        compiler_params=pltpu.CompilerParams(
            dimension_semantics=("parallel", "parallel"),
        ),
        cost_estimate=cost,
    )(x2d, w_t, bias_row)

    return out2d.reshape(*orig_shape[:-1], N)


def init_params(key, in_features=HIDDEN, out_features=HIDDEN):
    """Deterministic param init matching the module:
    weight ~ xavier_normal_, bias ~ default nn.Linear uniform(-1/sqrt(in), 1/sqrt(in))."""
    kw, kb = jax.random.split(key)
    std = (2.0 / (in_features + out_features)) ** 0.5
    weight = std * jax.random.normal(kw, (out_features, in_features), jnp.float32)
    bound = 1.0 / (in_features ** 0.5)
    bias = jax.random.uniform(
        kb, (out_features,), jnp.float32, minval=-bound, maxval=bound
    )
    return weight, bias


if __name__ == "__main__":
    key = jax.random.PRNGKey(0)
    kx, kp = jax.random.split(key)

    batch, seq = 2, 8
    x = jax.random.normal(kx, (batch, seq, HIDDEN), jnp.float32)
    weight, bias = init_params(kp)

    # One-time layout/dtype prep (outside the per-call path).
    w_t, bias_row = prepare_params(weight, bias)

    y = linear_project(x, w_t, bias_row)
    jax.block_until_ready(y)
    assert y.shape == (batch, seq, HIDDEN)

    # Reference 1: same math the kernel does (bf16 operands, f32 accumulate) -- tight.
    x2d = x.reshape(-1, HIDDEN)
    y_bf16_ref = (
        jnp.dot(x2d.astype(jnp.bfloat16), w_t, preferred_element_type=jnp.float32)
        + bias
    ).reshape(x.shape)
    assert jnp.allclose(y, y_bf16_ref, atol=2e-3, rtol=2e-3)

    # Reference 2: full-f32 PyTorch nn.Linear semantics -- loose (bf16 weight rounding).
    y_f32_ref = x @ weight.T + bias
    assert jnp.allclose(y, y_f32_ref, atol=6e-2, rtol=6e-2)

    print("KERNEL_OK")
</pallas_src>

<mosaic_0001>
module attributes {stable_mosaic.version = 11 : i64} {
  func.func @_linear_kernel(%arg0: i32, %arg1: i32, %arg2: memref<16x768xf32, #tpu.memory_space<vmem>>, %arg3: memref<768x768xbf16, #tpu.memory_space<vmem>>, %arg4: memref<1x768xf32, #tpu.memory_space<vmem>>, %arg5: memref<16x768xf32, #tpu.memory_space<vmem>>) attributes {dimension_semantics = [#tpu.dimension_semantics<parallel>, #tpu.dimension_semantics<parallel>], iteration_bounds = array<i64: 1, 1>, scalar_prefetch = 0 : i64, scratch_operands = 0 : i64, tpu.core_type = #tpu.core_type<tc>, window_params = [{transform_indices = @transform_0, window_bounds = array<i64: 16, 768>}, {pipeline_mode = #tpu.pipeline_mode<synchronous>, transform_indices = @transform_1, window_bounds = array<i64: 768, 768>}, {pipeline_mode = #tpu.pipeline_mode<synchronous>, transform_indices = @transform_2, window_bounds = array<i64: 1, 768>}, {transform_indices = @transform_3, window_bounds = array<i64: 16, 768>}]} {
    %c0 = arith.constant 0 : index
    %c0_0 = arith.constant 0 : index
    %0 = vector.load %arg2[%c0, %c0_0] : memref<16x768xf32, #tpu.memory_space<vmem>>, vector<16x768xf32>
    %1 = arith.truncf %0 : vector<16x768xf32> to vector<16x768xbf16>
    %c0_1 = arith.constant 0 : index
    %c0_2 = arith.constant 0 : index
    %2 = vector.load %arg3[%c0_1, %c0_2] : memref<768x768xbf16, #tpu.memory_space<vmem>>, vector<768x768xbf16>
    %cst = arith.constant dense<0.000000e+00> : vector<16x768xf32>
    %3 = tpu.matmul %1, %2, %cst {dimension_numbers = #tpu.dot_dimension_numbers<[1], [0], [0], [1], [0, 0, 1, 1], [], []>} : vector<16x768xbf16>, vector<768x768xbf16>, vector<16x768xf32> -> vector<16x768xf32>
    %c0_3 = arith.constant 0 : index
    %c0_4 = arith.constant 0 : index
    %4 = vector.load %arg4[%c0_3, %c0_4] : memref<1x768xf32, #tpu.memory_space<vmem>>, vector<1x768xf32>
    %5 = vector.broadcast %4 : vector<1x768xf32> to vector<16x768xf32>
    %6 = arith.addf %3, %5 : vector<16x768xf32>
    %c0_5 = arith.constant 0 : index
    %c0_6 = arith.constant 0 : index
    %7 = vector.load %arg5[%c0_5, %c0_6] : memref<16x768xf32, #tpu.memory_space<vmem>>, vector<16x768xf32>
    tpu.vector_store %arg5[%c0_5, %c0_6], %6 {strides = array<i32>} : memref<16x768xf32, #tpu.memory_space<vmem>>, vector<16x768xf32>,
    return
  }
  func.func @transform_0(%arg0: i32, %arg1: i32) -> (i32, i32) {
    %c0_i32 = arith.constant 0 : i32
    %c0_i32_0 = arith.constant 0 : i32
    return %arg0, %c0_i32 : i32, i32
  }
  func.func @transform_1(%arg0: i32, %arg1: i32) -> (i32, i32) {
    %c0_i32 = arith.constant 0 : i32
    %c0_i32_0 = arith.constant 0 : i32
    return %c0_i32, %arg1 : i32, i32
  }
  func.func @transform_2(%arg0: i32, %arg1: i32) -> (i32, i32) {
    %c0_i32 = arith.constant 0 : i32
    %c0_i32_0 = arith.constant 0 : i32
    return %c0_i32, %arg1 : i32, i32
  }
  func.func @transform_3(%arg0: i32, %arg1: i32) -> (i32, i32) {
    %c0_i32 = arith.constant 0 : i32
    return %arg0, %arg1 : i32, i32
  }
}

</mosaic_0001>

<bundles_post_ra>
// kernel: tpu_custom_call.1
= control target key start
LH: loop header
LB: loop body
LE: loop exit
PB: predicated region body
PF: predicated region fallthrough
CT: control target
= control target key end

     0   :  { %8 = vsyncpa [#allocation3], 0  ;;  %s4019_s0 = inlined_call_operand.hbm [shape: f32[16,768], index: 0, kind: input, shape index: {}]   ;;  %s4020_s1 = inlined_call_operand.hbm [shape: bf16[768,768], index: 1, kind: input, shape index: {}]   ;;  %s4021_s2 = inlined_call_operand.hbm [shape: f32[1,768], index: 2, kind: input, shape index: {}]   ;;  %s4022_s3 = inlined_call_operand.hbm [shape: f32[16,768], index: 3, kind: output, shape index: {}]  }
   0x1   :  { %9 = vsyncpa [#allocation6], 0  ;;  %s28_s14 = sshll.u32 %s4020_s1, 4  ;;  %s29_s14 = int_to_ptr.hbm [resolvable:$true] %s28_s14 }
   0x2   :  { %10 = vsyncpa [#allocation4], 0  ;;  %s3907_s15 = smov [#allocation5]   ;;  %s15_s19 = sshll.u32 %s4019_s0, 4  ;;  %s16_s19 = int_to_ptr.hbm [resolvable:$true] %s15_s19 }
   0x3   :  { %s30_s16 = sshll.u32 %s3907_s15, 4  ;;  %s3908_s20 = smov 384   ;;  %s31_s16 = int_to_ptr.vmem [resolvable:$true] %s30_s16 }
   0x4   :  { %s3909_s21 = smov 24   ;;  %s3910_s22 = smov [#allocation2]  }
   0x5   :  { %36 = dma.hbm_to_vmem [thread:$0]  %s29_s14, 36864, %s31_s16, [#allocation6], %s3908_s20, %s3908_s20, %s3909_s21  }
   0x6   :  { %s17_s23 = sshll.u32 %s3910_s22, 4  ;;  %s3911_s24 = smov 768   ;;  %s18_s23 = int_to_ptr.vmem [resolvable:$true] %s17_s23 }
   0x7   :  { %s3912_s25 = smov 48   ;;  %s42_s27 = sshll.u32 %s4021_s2, 4  ;;  %s43_s27 = int_to_ptr.hbm [resolvable:$true] %s42_s27 }
   0x8   :  { %23 = dma.hbm_to_vmem [thread:$0]  %s16_s19, 1536, %s18_s23, [#allocation3], %s3911_s24, %s3911_s24, %s3912_s25  }
   0x9   :  { %s3913_s28 = smov [#allocation7]  }
   0xa   :  { %s44_s0 = sshll.u32 %s3913_s28, 4  ;;  %s45_s0 = int_to_ptr.vmem [resolvable:$true] %s44_s0 }
   0xb   :  { %47 = dma.hbm_to_vmem [thread:$0]  %s43_s27, 96, %s45_s0, [#allocation6]  }
   0xc   :  { %3901 = dma.done.wait [#allocation3], 1536  }
   0xd   :  { %3902 = vsyncadd [#allocation3], 4294965760 }
   0xe   :  { %3903 = dma.done.wait [#allocation6], 36960  }
   0xf   :  { %3904 = vsyncadd [#allocation6], 4294930336  ;;  %v2526_v0 = vld [vmem:[#allocation5 + $0x150] sm:$0xf]  ;;  %v3553_v1 = vld [vmem:[#allocation5 + $0x164] sm:$0xf0] }
  0x10   :  { %v2718_v2 = vld [vmem:[#allocation5 + $0x2d0] sm:$0xf]  ;;  %v2527_v3 = vor.u32 %v3553_v1, %v2526_v0  ;;  %v3601_v4 = vld [vmem:[#allocation5 + $0x2e4] sm:$0xf0]  ;;  %v2502_v11 = vld [vmem:[#allocation5 + $0x120] sm:$0xf] }
  0x11   :  { %v2910_v5 = vld [vmem:[#allocation5 + $0x450] sm:$0xf]  ;;  %v3649_v6 = vld [vmem:[#allocation5 + $0x464] sm:$0xf0]  ;;  %v2719_v7 = vor.u32 %v3601_v4, %v2718_v2  ;;  %v3547_v13 = vld [vmem:[#allocation5 + $0x134] sm:$0xf0] }
  0x12   :  { %v2911_v8 = vor.u32 %v3649_v6, %v2910_v5  ;;  %v3102_v9 = vld [vmem:[#allocation5 + $0x5d0] sm:$0xf]  ;;  %v3697_v10 = vld [vmem:[#allocation5 + $0x5e4] sm:$0xf0]  ;;  %1820 = vmatpush.bf16.msra.mxu0 %v2527_v3  ;;  %v2694_v14 = vld [vmem:[#allocation5 + $0x2a0] sm:$0xf]  ;;  %v2503_v16 = vor.u32 %v3547_v13, %v2502_v11 }
  0x13   :  { %v3103_v12 = vor.u32 %v3697_v10, %v3102_v9  ;;  %v3595_v15 = vld [vmem:[#allocation5 + $0x2b4] sm:$0xf0]  ;;  %1834 = vmatpush.bf16.msra.mxu1 %v2719_v7  ;;  %v2886_v18 = vld [vmem:[#allocation5 + $0x420] sm:$0xf]  ;;  %v2478_v23 = vld [vmem:[#allocation5 + $0xf0] sm:$0xf] }
  0x14   :  { %1848 = vmatpush.bf16.msra.mxu2 %v2911_v8  ;;  %v2695_v17 = vor.u32 %v3595_v15, %v2694_v14  ;;  %v3643_v19 = vld [vmem:[#allocation5 + $0x434] sm:$0xf0]  ;;  %v3078_v20 = vld [vmem:[#allocation5 + $0x5a0] sm:$0xf]  ;;  %v3541_v24 = vld [vmem:[#allocation5 + $0x104] sm:$0xf0] }
  0x15   :  { %1862 = vmatpush.bf16.msra.mxu3 %v3103_v12  ;;  %v2887_v21 = vor.u32 %v3643_v19, %v2886_v18  ;;  %v3691_v22 = vld [vmem:[#allocation5 + $0x5b4] sm:$0xf0]  ;;  %v2670_v26 = vld [vmem:[#allocation5 + $0x270] sm:$0xf]  ;;  %v3589_v27 = vld [vmem:[#allocation5 + $0x284] sm:$0xf0]  ;;  %v2479_v29 = vor.u32 %v3541_v24, %v2478_v23 }
  0x16   :  { %v3079_v25 = vor.u32 %v3691_v22, %v3078_v20  ;;  %v2862_v28 = vld [vmem:[#allocation5 + $0x3f0] sm:$0xf]  ;;  %1821 = vmatpush.bf16.msra.mxu0 %v2503_v16  ;;  %v3637_v30 = vld [vmem:[#allocation5 + $0x404] sm:$0xf0]  ;;  %v2671_v33 = vor.u32 %v3589_v27, %v2670_v26  ;;  %v2454_v35 = vld [vmem:[#allocation5 + $0xc0] sm:$0xf] }
  0x17   :  { %v3054_v31 = vld [vmem:[#allocation5 + $0x570] sm:$0xf]  ;;  %v3685_v32 = vld [vmem:[#allocation5 + $0x584] sm:$0xf0]  ;;  %1835 = vmatpush.bf16.msra.mxu1 %v2695_v17  ;;  %v2863_v34 = vor.u32 %v3637_v30, %v2862_v28  ;;  %v3535_v36 = vld [vmem:[#allocation5 + $0xd4] sm:$0xf0] }
  0x18   :  { %1849 = vmatpush.bf16.msra.mxu2 %v2887_v21  ;;  %v2646_v37 = vld [vmem:[#allocation5 + $0x240] sm:$0xf]  ;;  %v3055_v38 = vor.u32 %v3685_v32, %v3054_v31  ;;  %v3583_v39 = vld [vmem:[#allocation5 + $0x254] sm:$0xf0]  ;;  %v2455_v44 = vor.u32 %v3535_v36, %v2454_v35  ;;  %v2430_v47 = vld [vmem:[#allocation5 + $0x90] sm:$0xf] }
  0x19   :  { %1863 = vmatpush.bf16.msra.mxu3 %v3079_v25  ;;  %v2838_v40 = vld [vmem:[#allocation5 + $0x3c0] sm:$0xf]  ;;  %v3631_v41 = vld [vmem:[#allocation5 + $0x3d4] sm:$0xf0]  ;;  %v2647_v45 = vor.u32 %v3583_v39, %v2646_v37  ;;  %v3529_v48 = vld [vmem:[#allocation5 + $0xa4] sm:$0xf0] }
  0x1a   :  { %v3030_v42 = vld [vmem:[#allocation5 + $0x540] sm:$0xf]  ;;  %v3679_v43 = vld [vmem:[#allocation5 + $0x554] sm:$0xf0]  ;;  %1822 = vmatpush.bf16.msra.mxu0 %v2479_v29  ;;  %v2839_v46 = vor.u32 %v3631_v41, %v2838_v40  ;;  %v2622_v49 = vld [vmem:[#allocation5 + $0x210] sm:$0xf]  ;;  %v2431_v56 = vor.u32 %v3529_v48, %v2430_v47 }
  0x1b   :  { %1836 = vmatpush.bf16.msra.mxu1 %v2671_v33  ;;  %v3031_v50 = vor.u32 %v3679_v43, %v3030_v42  ;;  %v3577_v51 = vld [vmem:[#allocation5 + $0x224] sm:$0xf0]  ;;  %v2814_v52 = vld [vmem:[#allocation5 + $0x390] sm:$0xf]  ;;  %v2406_v59 = vld [vmem:[#allocation5 + $0x60] sm:$0xf] }
  0x1c   :  { %1850 = vmatpush.bf16.msra.mxu2 %v2863_v34  ;;  %v3625_v53 = vld [vmem:[#allocation5 + $0x3a4] sm:$0xf0]  ;;  %v3006_v54 = vld [vmem:[#allocation5 + $0x510] sm:$0xf]  ;;  %v2623_v57 = vor.u32 %v3577_v51, %v2622_v49  ;;  %v3523_v60 = vld [vmem:[#allocation5 + $0x74] sm:$0xf0] }
  0x1d   :  { %1864 = vmatpush.bf16.msra.mxu3 %v3055_v38  ;;  %v3673_v55 = vld [vmem:[#allocation5 + $0x524] sm:$0xf0]  ;;  %v2815_v58 = vor.u32 %v3625_v53, %v2814_v52  ;;  %v2598_v61 = vld [vmem:[#allocation5 + $0x1e0] sm:$0xf]  ;;  %v3571_v63 = vld [vmem:[#allocation5 + $0x1f4] sm:$0xf0]  ;;  %v2407_v4 = vor.u32 %v3523_v60, %v2406_v59 }
  0x1e   :  { %1823 = vmatpush.bf16.msra.mxu0 %v2455_v44  ;;  %v3007_v62 = vor.u32 %v3673_v55, %v3006_v54  ;;  %v2790_v0 = vld [vmem:[#allocation5 + $0x360] sm:$0xf]  ;;  %v3619_v1 = vld [vmem:[#allocation5 + $0x374] sm:$0xf0]  ;;  %v2599_v5 = vor.u32 %v3571_v63, %v2598_v61  ;;  %v2382_v7 = vld [vmem:[#allocation5 + $0x30] sm:$0xf] }
  0x1f   :  { %1837 = vmatpush.bf16.msra.mxu1 %v2647_v45  ;;  %v2982_v2 = vld [vmem:[#allocation5 + $0x4e0] sm:$0xf]  ;;  %v3667_v3 = vld [vmem:[#allocation5 + $0x4f4] sm:$0xf0]  ;;  %v2791_v6 = vor.u32 %v3619_v1, %v2790_v0  ;;  %v3517_v8 = vld [vmem:[#allocation5 + $0x44] sm:$0xf0] }
  0x20   :  { %1851 = vmatpush.bf16.msra.mxu2 %v2839_v46  ;;  %v2574_v9 = vld [vmem:[#allocation5 + $0x1b0] sm:$0xf]  ;;  %v2983_v10 = vor.u32 %v3667_v3, %v2982_v2  ;;  %v3565_v11 = vld [vmem:[#allocation5 + $0x1c4] sm:$0xf0]  ;;  %v2383_v16 = vor.u32 %v3517_v8, %v2382_v7  ;;  %v2358_v17 = vld [vmem:[#allocation5] sm:$0xf] }
  0x21   :  { %1865 = vmatpush.bf16.msra.mxu3 %v3031_v50  ;;  %v2766_v12 = vld [vmem:[#allocation5 + $0x330] sm:$0xf]  ;;  %v3613_v13 = vld [vmem:[#allocation5 + $0x344] sm:$0xf0]  ;;  %v3511_v18 = vld [vmem:[#allocation5 + $0x14] sm:$0xf0]  ;;  %v2575_v19 = vor.u32 %v3565_v11, %v2574_v9 }
  0x22   :  { %1824 = vmatpush.bf16.msra.mxu0 %v2431_v56  ;;  %v2958_v14 = vld [vmem:[#allocation5 + $0x4b0] sm:$0xf]  ;;  %v3661_v15 = vld [vmem:[#allocation5 + $0x4c4] sm:$0xf0]  ;;  %v2767_v20 = vor.u32 %v3613_v13, %v2766_v12  ;;  %v2550_v21 = vld [vmem:[#allocation5 + $0x180] sm:$0xf]  ;;  %v2359_v31 = vor.u32 %v3511_v18, %v2358_v17 }
  0x23   :  { %1838 = vmatpush.bf16.msra.mxu1 %v2623_v57  ;;  %v3559_v22 = vld [vmem:[#allocation5 + $0x194] sm:$0xf0]  ;;  %v2742_v23 = vld [vmem:[#allocation5 + $0x300] sm:$0xf]  ;;  %v2959_v24 = vor.u32 %v3661_v15, %v2958_v14  ;;  %v3294_v28 = vld [vmem:[#allocation5 + $0x750] sm:$0xf] }
  0x24   :  { %1852 = vmatpush.bf16.msra.mxu2 %v2815_v58  ;;  %v3607_v25 = vld [vmem:[#allocation5 + $0x314] sm:$0xf0]  ;;  %v2934_v26 = vld [vmem:[#allocation5 + $0x480] sm:$0xf]  ;;  %v3745_v29 = vld [vmem:[#allocation5 + $0x764] sm:$0xf0]  ;;  %v2551_v35 = vor.u32 %v3559_v22, %v2550_v21 }
  0x25   :  { %1866 = vmatpush.bf16.msra.mxu3 %v3007_v62  ;;  %v3655_v27 = vld [vmem:[#allocation5 + $0x494] sm:$0xf0]  ;;  %v3486_v30 = vld [vmem:[#allocation5 + $0x8d0] sm:$0xf]  ;;  %v3793_v32 = vld [vmem:[#allocation5 + $0x8e4] sm:$0xf0]  ;;  %v2743_v36 = vor.u32 %v3607_v25, %v2742_v23  ;;  %v3295_v40 = vor.u32 %v3745_v29, %v3294_v28 }
  0x26   :  { %1825 = vmatpush.bf16.msra.mxu0 %v2407_v4  ;;  %v3550_v33 = vld [vmem:[#allocation5 + $0x154] sm:$0xf]  ;;  %v2528_v34 = vld [vmem:[#allocation5 + $0x168] sm:$0xf0]  ;;  %v2935_v39 = vor.u32 %v3655_v27, %v2934_v26  ;;  %v3270_v41 = vld [vmem:[#allocation5 + $0x720] sm:$0xf]  ;;  %v3487_v42 = vor.u32 %v3793_v32, %v3486_v30 }
  0x27   :  { %1839 = vmatpush.bf16.msra.mxu1 %v2599_v5  ;;  %v3598_v37 = vld [vmem:[#allocation5 + $0x2d4] sm:$0xf]  ;;  %v2720_v38 = vld [vmem:[#allocation5 + $0x2e8] sm:$0xf0]  ;;  %v2531_v43 = vor.u32 %v3550_v33, %v2528_v34  ;;  %v3739_v44 = vld [vmem:[#allocation5 + $0x734] sm:$0xf0] }
  0x28   :  { %1853 = vmatpush.bf16.msra.mxu2 %v2791_v6  ;;  %v3462_v45 = vld [vmem:[#allocation5 + $0x8a0] sm:$0xf]  ;;  %v3787_v46 = vld [vmem:[#allocation5 + $0x8b4] sm:$0xf0]  ;;  %v2723_v47 = vor.u32 %v3598_v37, %v2720_v38  ;;  %v3544_v48 = vld [vmem:[#allocation5 + $0x124] sm:$0xf]  ;;  %v3271_v54 = vor.u32 %v3739_v44, %v3270_v41 }
  0x29   :  { %1867 = vmatpush.bf16.msra.mxu3 %v2983_v10  ;;  %v2504_v49 = vld [vmem:[#allocation5 + $0x138] sm:$0xf0]  ;;  %v3592_v50 = vld [vmem:[#allocation5 + $0x2a4] sm:$0xf]  ;;  %v66_v53 = vld [vmem:[#allocation2 + $0x30] sm:$0xff]  ;;  %v3463_v58 = vor.u32 %v3787_v46, %v3462_v45  ;;  %s3914_s2 = smov [#allocation8]  }
  0x2a   :  { %1826 = vmatpush.bf16.msra.mxu0 %v2383_v16  ;;  %v2696_v51 = vld [vmem:[#allocation5 + $0x2b8] sm:$0xf0]  ;;  %v60_v52 = vld [vmem:[#allocation2] sm:$0xff]  ;;  %v3246_v55 = vld [vmem:[#allocation5 + $0x6f0] sm:$0xf]  ;;  %v2507_v59 = vor.u32 %v3544_v48, %v2504_v49  ;;  %s2340_s29 = sshll.u32 %s3914_s2, 4  ;;  %s2341_s29 = int_to_ptr.vmem [resolvable:$true] %s2340_s29 }
  0x2b   :  { %1840 = vmatpush.bf16.msra.mxu1 %v2575_v19  ;;  %v3733_v56 = vld [vmem:[#allocation5 + $0x704] sm:$0xf0]  ;;  %v3947_v57 = vpack.c.bf16 %v66_v53, %v60_v52  ;;  %v3438_v60 = vld [vmem:[#allocation5 + $0x870] sm:$0xf]  ;;  %v3538_v62 = vld [vmem:[#allocation5 + $0xf4] sm:$0xf]  ;;  %v2699_v63 = vor.u32 %v3592_v50, %v2696_v51 }
  0x2c   :  { %1854 = vmatpush.bf16.msra.mxu2 %v2767_v20  ;;  %v3781_v61 = vld [vmem:[#allocation5 + $0x884] sm:$0xf0]  ;;  %v2480_v0 = vld [vmem:[#allocation5 + $0x108] sm:$0xf0]  ;;  %v67_v2 = vld [vmem:[#allocation2 + $0x38] sm:$0xff]  ;;  %v3247_v7 = vor.u32 %v3733_v56, %v3246_v55  ;;  %s2342_s5 = sshll.u32 %s4022_s3, 4  ;;  %s2343_s5 = int_to_ptr.hbm [resolvable:$true] %s2342_s5 }
  0x2d   :  { %1868 = vmatpush.bf16.msra.mxu3 %v2959_v24  ;;  %v61_v1 = vld [vmem:[#allocation2 + $0x8] sm:$0xff]  ;;  %v3586_v3 = vld [vmem:[#allocation5 + $0x274] sm:$0xf]  ;;  %v3222_v5 = vld [vmem:[#allocation5 + $0x6c0] sm:$0xf]  ;;  %v3439_v11 = vor.u32 %v3781_v61, %v3438_v60  ;;  %v2483_v12 = vor.u32 %v3538_v62, %v2480_v0 }
  0x2e   :  { %1827 = vmatpush.bf16.msra.mxu0 %v2359_v31  ;;  %v2672_v4 = vld [vmem:[#allocation5 + $0x288] sm:$0xf0]  ;;  %v3950_v6 = vpack.c.bf16 %v67_v2, %v61_v1  ;;  %v3727_v8 = vld [vmem:[#allocation5 + $0x6d4] sm:$0xf0]  ;;  %v3414_v9 = vld [vmem:[#allocation5 + $0x840] sm:$0xf] }
  0x2f   :  { %1841 = vmatpush.bf16.msra.mxu1 %v2551_v35  ;;  %v3775_v10 = vld [vmem:[#allocation5 + $0x854] sm:$0xf0]  ;;  %v3532_v13 = vld [vmem:[#allocation5 + $0xc4] sm:$0xf]  ;;  %v2456_v14 = vld [vmem:[#allocation5 + $0xd8] sm:$0xf0]  ;;  %v2675_v16 = vor.u32 %v3586_v3, %v2672_v4  ;;  %v3223_v24 = vor.u32 %v3727_v8, %v3222_v5 }
  0x30   :  { %1855 = vmatpush.bf16.msra.mxu2 %v2743_v36  ;;  %v62_v15 = vld [vmem:[#allocation2 + $0x10] sm:$0xff]  ;;  %v68_v17 = vld [vmem:[#allocation2 + $0x40] sm:$0xff]  ;;  %v63_v18 = vld [vmem:[#allocation2 + $0x18] sm:$0xff]  ;;  %v3415_v25 = vor.u32 %v3775_v10, %v3414_v9  ;;  %v2459_v26 = vor.u32 %v3532_v13, %v2456_v14 }
  0x31   :  { %1869 = vmatpush.bf16.msra.mxu3 %v2935_v39  ;;  %1828 = vmatmul.bf16.vlgmr.msra.gmra.mxu0 %v3947_v57  ;;  %v69_v19 = vld [vmem:[#allocation2 + $0x48] sm:$0xff]  ;;  %v3580_v20 = vld [vmem:[#allocation5 + $0x244] sm:$0xf]  ;;  %v2648_v21 = vld [vmem:[#allocation5 + $0x258] sm:$0xf0]  ;;  %v3953_v22 = vpack.c.bf16 %v68_v17, %v62_v15 }
  0x32   :  { %1876 = vmatpush.bf16.msrb.mxu0 %v3295_v40  ;;  %1842 = vmatmul.bf16.vlgmr.msra.gmra.mxu1 %v3950_v6  ;;  %v3955_v23 = vpack.c.bf16 %v69_v19, %v63_v18  ;;  %v3198_v27 = vld [vmem:[#allocation5 + $0x690] sm:$0xf]  ;;  %v3721_v28 = vld [vmem:[#allocation5 + $0x6a4] sm:$0xf0]  ;;  %v2651_v30 = vor.u32 %v3580_v20, %v2648_v21  ;;  %v3526_v32 = vld [vmem:[#allocation5 + $0x94] sm:$0xf] }
  0x33   :  { %1890 = vmatpush.bf16.msrb.mxu1 %v3487_v42  ;;  %v3390_v29 = vld [vmem:[#allocation5 + $0x810] sm:$0xf]  ;;  %v3769_v31 = vld [vmem:[#allocation5 + $0x824] sm:$0xf0]  ;;  %v2432_v33 = vld [vmem:[#allocation5 + $0xa8] sm:$0xf0]  ;;  %1856 = vmatmul.bf16.vlgmr.msra.gmra.mxu2 %v3953_v22  ;;  %v3199_v36 = vor.u32 %v3721_v28, %v3198_v27 }
  0x34   :  { %1904 = vmatpush.bf16.msrb.mxu2 %v2531_v43  ;;  %v3574_v34 = vld [vmem:[#allocation5 + $0x214] sm:$0xf]  ;;  %v2624_v35 = vld [vmem:[#allocation5 + $0x228] sm:$0xf0]  ;;  %1870 = vmatmul.bf16.vlgmr.msra.gmra.mxu3 %v3955_v23  ;;  %v3391_v37 = vor.u32 %v3769_v31, %v3390_v29  ;;  %v2435_v38 = vor.u32 %v3526_v32, %v2432_v33  ;;  %v3174_v39 = vld [vmem:[#allocation5 + $0x660] sm:$0xf] }
  0x35   :  { %1918 = vmatpush.bf16.msrb.mxu3 %v2723_v47  ;;  %v3715_v40 = vld [vmem:[#allocation5 + $0x674] sm:$0xf0]  ;;  %v3366_v41 = vld [vmem:[#allocation5 + $0x7e0] sm:$0xf]  ;;  %v2627_v42 = vor.u32 %v3574_v34, %v2624_v35  ;;  %v3520_v44 = vld [vmem:[#allocation5 + $0x64] sm:$0xf] }
  0x36   :  { %1877 = vmatpush.bf16.msrb.mxu0 %v3271_v54  ;;  %v3763_v43 = vld [vmem:[#allocation5 + $0x7f4] sm:$0xf0]  ;;  %v2408_v45 = vld [vmem:[#allocation5 + $0x78] sm:$0xf0]  ;;  %v3568_v46 = vld [vmem:[#allocation5 + $0x1e4] sm:$0xf]  ;;  %v3175_v48 = vor.u32 %v3715_v40, %v3174_v39 }
  0x37   :  { %1891 = vmatpush.bf16.msrb.mxu1 %v3463_v58  ;;  %v2600_v47 = vld [vmem:[#allocation5 + $0x1f8] sm:$0xf0]  ;;  %v3367_v49 = vor.u32 %v3763_v43, %v3366_v41  ;;  %v2411_v50 = vor.u32 %v3520_v44, %v2408_v45  ;;  %v3150_v51 = vld [vmem:[#allocation5 + $0x630] sm:$0xf]  ;;  %v3709_v52 = vld [vmem:[#allocation5 + $0x644] sm:$0xf0] }
  0x38   :  { %1905 = vmatpush.bf16.msrb.mxu2 %v2507_v59  ;;  %v3342_v53 = vld [vmem:[#allocation5 + $0x7b0] sm:$0xf]  ;;  %v2603_v54 = vor.u32 %v3568_v46, %v2600_v47  ;;  %v3757_v55 = vld [vmem:[#allocation5 + $0x7c4] sm:$0xf0]  ;;  %v3514_v56 = vld [vmem:[#allocation5 + $0x34] sm:$0xf]  ;;  %v3151_v61 = vor.u32 %v3709_v52, %v3150_v51 }
  0x39   :  { %1919 = vmatpush.bf16.msrb.mxu3 %v2699_v63  ;;  %v2384_v58 = vld [vmem:[#allocation5 + $0x48] sm:$0xf0]  ;;  %v3562_v59 = vld [vmem:[#allocation5 + $0x1b4] sm:$0xf]  ;;  %v3126_v62 = vld [vmem:[#allocation5 + $0x600] sm:$0xf]  ;;  %v3343_v1 = vor.u32 %v3757_v55, %v3342_v53 }
  0x3a   :  { %1878 = vmatpush.bf16.msrb.mxu0 %v3247_v7  ;;  %v2576_v60 = vld [vmem:[#allocation5 + $0x1c8] sm:$0xf0]  ;;  %v3703_v63 = vld [vmem:[#allocation5 + $0x614] sm:$0xf0]  ;;  %v3318_v0 = vld [vmem:[#allocation5 + $0x780] sm:$0xf]  ;;  %v2387_v2 = vor.u32 %v3514_v56, %v2384_v58 }
  0x3b   :  { %1892 = vmatpush.bf16.msrb.mxu1 %v3439_v11  ;;  %v3751_v3 = vld [vmem:[#allocation5 + $0x794] sm:$0xf0]  ;;  %v3508_v4 = vld [vmem:[#allocation5 + $0x4] sm:$0xf]  ;;  %v2360_v5 = vld [vmem:[#allocation5 + $0x18] sm:$0xf0]  ;;  %v2579_v7 = vor.u32 %v3562_v59, %v2576_v60  ;;  %v3127_v14 = vor.u32 %v3703_v63, %v3126_v62 }
  0x3c   :  { %1906 = vmatpush.bf16.msrb.mxu2 %v2483_v12  ;;  %v3556_v8 = vld [vmem:[#allocation5 + $0x184] sm:$0xf]  ;;  %v2552_v9 = vld [vmem:[#allocation5 + $0x198] sm:$0xf0]  ;;  %v3646_v10 = vld [vmem:[#allocation5 + $0x454] sm:$0xf]  ;;  %v3319_v18 = vor.u32 %v3751_v3, %v3318_v0  ;;  %v2363_v19 = vor.u32 %v3508_v4, %v2360_v5 }
  0x3d   :  { %1920 = vmatpush.bf16.msrb.mxu3 %v2675_v16  ;;  %v2912_v11 = vld [vmem:[#allocation5 + $0x468] sm:$0xf0]  ;;  %v3694_v12 = vld [vmem:[#allocation5 + $0x5d4] sm:$0xf]  ;;  %v64_v21 = vld [vmem:[#allocation2 + $0x20] sm:$0xff] }
  0x3e   :  { %1879 = vmatpush.bf16.msrb.mxu0 %v3223_v24  ;;  %v3104_v13 = vld [vmem:[#allocation5 + $0x5e8] sm:$0xf0]  ;;  %v3742_v15 = vld [vmem:[#allocation5 + $0x754] sm:$0xf]  ;;  %v71_v28 = vld [vmem:[#allocation2 + $0x58] sm:$0xff] }
  0x3f   :  { %1893 = vmatpush.bf16.msrb.mxu1 %v3415_v25  ;;  %v3296_v16 = vld [vmem:[#allocation5 + $0x768] sm:$0xf0]  ;;  %v3790_v17 = vld [vmem:[#allocation5 + $0x8d4] sm:$0xf]  ;;  %v2555_v25 = vor.u32 %v3556_v8, %v2552_v9  ;;  %v3107_v29 = vor.u32 %v3694_v12, %v3104_v13  ;;  %v3640_v31 = vld [vmem:[#allocation5 + $0x424] sm:$0xf] }
  0x40   :  { %1907 = vmatpush.bf16.msrb.mxu2 %v2459_v26  ;;  %v3488_v20 = vld [vmem:[#allocation5 + $0x8e8] sm:$0xf0]  ;;  %v70_v24 = vld [vmem:[#allocation2 + $0x50] sm:$0xff]  ;;  %v2915_v26 = vor.u32 %v3646_v10, %v2912_v11  ;;  %v2888_v32 = vld [vmem:[#allocation5 + $0x438] sm:$0xf0] }
  0x41   :  { %1921 = vmatpush.bf16.msrb.mxu3 %v2651_v30  ;;  %v65_v27 = vld [vmem:[#allocation2 + $0x28] sm:$0xff]  ;;  %v3299_v30 = vor.u32 %v3742_v15, %v3296_v16  ;;  %v3688_v33 = vld [vmem:[#allocation5 + $0x5a4] sm:$0xf]  ;;  %v3491_v34 = vor.u32 %v3790_v17, %v3488_v20  ;;  %v3959_v35 = vpack.c.bf16 %v70_v24, %v64_v21  ;;  %v3464_v41 = vld [vmem:[#allocation5 + $0x8b8] sm:$0xf0] }
  0x42   :  { %1880 = vmatpush.bf16.msrb.mxu0 %v3199_v36  ;;  %v3080_v36 = vld [vmem:[#allocation5 + $0x5b8] sm:$0xf0]  ;;  %v3961_v39 = vpack.c.bf16 %v71_v28, %v65_v27  ;;  %v3784_v40 = vld [vmem:[#allocation5 + $0x8a4] sm:$0xf]  ;;  %v3634_v45 = vld [vmem:[#allocation5 + $0x3f4] sm:$0xf] }
  0x43   :  { %1894 = vmatpush.bf16.msrb.mxu1 %v3391_v37  ;;  %v3736_v37 = vld [vmem:[#allocation5 + $0x724] sm:$0xf]  ;;  %v3083_v43 = vor.u32 %v3688_v33, %v3080_v36  ;;  %v2864_v46 = vld [vmem:[#allocation5 + $0x408] sm:$0xf0]  ;;  %v3682_v47 = vld [vmem:[#allocation5 + $0x574] sm:$0xf] }
  0x44   :  { %1908 = vmatpush.bf16.msrb.mxu2 %v2435_v38  ;;  %v3272_v38 = vld [vmem:[#allocation5 + $0x738] sm:$0xf0]  ;;  %v3248_v51 = vld [vmem:[#allocation5 + $0x708] sm:$0xf0]  ;;  %v3778_v52 = vld [vmem:[#allocation5 + $0x874] sm:$0xf] }
  0x45   :  { %1922 = vmatpush.bf16.msrb.mxu3 %v2627_v42  ;;  %v2891_v42 = vor.u32 %v3640_v31, %v2888_v32  ;;  %v3275_v44 = vor.u32 %v3736_v37, %v3272_v38  ;;  %v3440_v53 = vld [vmem:[#allocation5 + $0x888] sm:$0xf0]  ;;  %v3628_v58 = vld [vmem:[#allocation5 + $0x3c4] sm:$0xf]  ;;  %v2840_v59 = vld [vmem:[#allocation5 + $0x3d8] sm:$0xf0] }
  0x46   :  { %1881 = vmatpush.bf16.msrb.mxu0 %v3175_v48  ;;  %v3467_v48 = vor.u32 %v3784_v40, %v3464_v41  ;;  %v3676_v60 = vld [vmem:[#allocation5 + $0x544] sm:$0xf]  ;;  %v3032_v62 = vld [vmem:[#allocation5 + $0x558] sm:$0xf0]  ;;  %v2843_v3 = vor.u32 %v3628_v58, %v2840_v59  ;;  %v2816_v8 = vld [vmem:[#allocation5 + $0x3a8] sm:$0xf0] }
  0x47   :  { %1895 = vmatpush.bf16.msrb.mxu1 %v3367_v49  ;;  %v3056_v49 = vld [vmem:[#allocation5 + $0x588] sm:$0xf0]  ;;  %v3724_v63 = vld [vmem:[#allocation5 + $0x6c4] sm:$0xf]  ;;  %v3224_v0 = vld [vmem:[#allocation5 + $0x6d8] sm:$0xf0]  ;;  %v3035_v4 = vor.u32 %v3676_v60, %v3032_v62 }
  0x48   :  { %1909 = vmatpush.bf16.msrb.mxu2 %v2411_v50  ;;  %v3730_v50 = vld [vmem:[#allocation5 + $0x6f4] sm:$0xf]  ;;  %v3059_v55 = vor.u32 %v3682_v47, %v3056_v49  ;;  %v3227_v5 = vor.u32 %v3724_v63, %v3224_v0  ;;  %v3008_v11 = vld [vmem:[#allocation5 + $0x528] sm:$0xf0]  ;;  %v2792_v20 = vld [vmem:[#allocation5 + $0x378] sm:$0xf0] }
  0x49   :  { %1923 = vmatpush.bf16.msrb.mxu3 %v2603_v54  ;;  %v2867_v54 = vor.u32 %v3634_v45, %v2864_v46  ;;  %v3251_v56 = vor.u32 %v3730_v50, %v3248_v51  ;;  %v3670_v9 = vld [vmem:[#allocation5 + $0x514] sm:$0xf]  ;;  %v3200_v13 = vld [vmem:[#allocation5 + $0x6a8] sm:$0xf0]  ;;  %v3664_v21 = vld [vmem:[#allocation5 + $0x4e4] sm:$0xf] }
  0x4a   :  { %1882 = vmatpush.bf16.msrb.mxu0 %v3151_v61  ;;  %v3443_v61 = vor.u32 %v3778_v52, %v3440_v53  ;;  %v3718_v12 = vld [vmem:[#allocation5 + $0x694] sm:$0xf]  ;;  %v3392_v15 = vld [vmem:[#allocation5 + $0x828] sm:$0xf0]  ;;  %v3011_v17 = vor.u32 %v3670_v9, %v3008_v11  ;;  %v3176_v27 = vld [vmem:[#allocation5 + $0x678] sm:$0xf0] }
  0x4b   :  { %1896 = vmatpush.bf16.msrb.mxu1 %v3343_v1  ;;  %v3772_v1 = vld [vmem:[#allocation5 + $0x844] sm:$0xf]  ;;  %v3610_v33 = vld [vmem:[#allocation5 + $0x334] sm:$0xf]  ;;  %v2960_v38 = vld [vmem:[#allocation5 + $0x4c8] sm:$0xf0] }
  0x4c   :  { %1910 = vmatpush.bf16.msrb.mxu2 %v2387_v2  ;;  %v3416_v2 = vld [vmem:[#allocation5 + $0x858] sm:$0xf0]  ;;  %v3760_v28 = vld [vmem:[#allocation5 + $0x7e4] sm:$0xf]  ;;  %v3658_v36 = vld [vmem:[#allocation5 + $0x4b4] sm:$0xf] }
  0x4d   :  { %1924 = vmatpush.bf16.msrb.mxu3 %v2579_v7  ;;  %v3622_v7 = vld [vmem:[#allocation5 + $0x394] sm:$0xf]  ;;  %v3419_v10 = vor.u32 %v3772_v1, %v3416_v2  ;;  %v3152_v41 = vld [vmem:[#allocation5 + $0x648] sm:$0xf0]  ;;  %v3604_v45 = vld [vmem:[#allocation5 + $0x304] sm:$0xf]  ;;  %v2963_v47 = vor.u32 %v3658_v36, %v2960_v38 }
  0x4e   :  { %1883 = vmatpush.bf16.msrb.mxu0 %v3127_v14  ;;  %v3766_v14 = vld [vmem:[#allocation5 + $0x814] sm:$0xf]  ;;  %v2819_v16 = vor.u32 %v3622_v7, %v2816_v8  ;;  %v2744_v46 = vld [vmem:[#allocation5 + $0x318] sm:$0xf0]  ;;  %v3652_v49 = vld [vmem:[#allocation5 + $0x484] sm:$0xf] }
  0x4f   :  { %1897 = vmatpush.bf16.msrb.mxu1 %v3319_v18  ;;  %v3203_v18 = vor.u32 %v3718_v12, %v3200_v13  ;;  %v3395_v24 = vor.u32 %v3766_v14, %v3392_v15  ;;  %v3706_v40 = vld [vmem:[#allocation5 + $0x634] sm:$0xf]  ;;  %v2936_v50 = vld [vmem:[#allocation5 + $0x498] sm:$0xf0]  ;;  %v3700_v51 = vld [vmem:[#allocation5 + $0x604] sm:$0xf]  ;;  %v2747_v60 = vor.u32 %v3604_v45, %v2744_v46 }
  0x50   :  { %1911 = vmatpush.bf16.msrb.mxu2 %v2363_v19  ;;  %v3616_v19 = vld [vmem:[#allocation5 + $0x364] sm:$0xf]  ;;  %v3128_v53 = vld [vmem:[#allocation5 + $0x618] sm:$0xf0]  ;;  %v3554_v58 = vld [vmem:[#allocation5 + $0x16c] sm:$0xf0]  ;;  %v2939_v0 = vor.u32 %v3652_v49, %v2936_v50 }
  0x51   :  { %1925 = vmatpush.bf16.msrb.mxu3 %v2555_v25  ;;  %1884 = vmatmul.bf16.vlgmr.msrb.gmra.mxu0 %v3959_v35  ;;  %v2984_v25 = vld [vmem:[#allocation5 + $0x4f8] sm:$0xf0]  ;;  %v2726_v59 = vld [vmem:[#allocation5 + $0x2d8] sm:$0xf]  ;;  %v3650_v63 = vld [vmem:[#allocation5 + $0x46c] sm:$0xf0]  ;;  %v3131_v1 = vor.u32 %v3700_v51, %v3128_v53 }
  0x52   :  { %1932 = vmatpush.bf16.msra.mxu0 %v2915_v26  ;;  %1898 = vmatmul.bf16.vlgmr.msrb.gmra.mxu1 %v3961_v39  ;;  %v3712_v26 = vld [vmem:[#allocation5 + $0x664] sm:$0xf]  ;;  %v2987_v31 = vor.u32 %v3664_v21, %v2984_v25  ;;  %v2918_v62 = vld [vmem:[#allocation5 + $0x458] sm:$0xf]  ;;  %v2510_v9 = vld [vmem:[#allocation5 + $0x128] sm:$0xf] }
  0x53   :  { %1946 = vmatpush.bf16.msra.mxu1 %v3107_v29  ;;  %1912 = vmatmul.bf16.vlgmr.msrb.gmra.mxu2 %v3947_v57  ;;  %v3368_v29 = vld [vmem:[#allocation5 + $0x7f8] sm:$0xf0]  ;;  %v3179_v32 = vor.u32 %v3712_v26, %v3176_v27  ;;  %v3110_v2 = vld [vmem:[#allocation5 + $0x5d8] sm:$0xf]  ;;  %v2919_v8 = vor.u32 %v3650_v63, %v2918_v62  ;;  %v2702_v11 = vld [vmem:[#allocation5 + $0x2a8] sm:$0xf] }
  0x54   :  { %1960 = vmatpush.bf16.msra.mxu2 %v3299_v30  ;;  %1926 = vmatmul.bf16.vlgmr.msrb.gmra.mxu3 %v3950_v6  ;;  %v2795_v30 = vor.u32 %v3616_v19, %v2792_v20  ;;  %v3371_v37 = vor.u32 %v3760_v28, %v3368_v29  ;;  %v3596_v13 = vld [vmem:[#allocation5 + $0x2bc] sm:$0xf0]  ;;  %v2894_v14 = vld [vmem:[#allocation5 + $0x428] sm:$0xf]  ;;  %v2486_v21 = vld [vmem:[#allocation5 + $0xf8] sm:$0xf] }
  0x55   :  { %1974 = vmatpush.bf16.msra.mxu3 %v3491_v34  ;;  %v2768_v34 = vld [vmem:[#allocation5 + $0x348] sm:$0xf0]  ;;  %v3644_v15 = vld [vmem:[#allocation5 + $0x43c] sm:$0xf0]  ;;  %v2703_v19 = vor.u32 %v3596_v13, %v2702_v11  ;;  %v2678_v25 = vld [vmem:[#allocation5 + $0x278] sm:$0xf] }
  0x56   :  { %1933 = vmatpush.bf16.msra.mxu0 %v2891_v42  ;;  %v3754_v42 = vld [vmem:[#allocation5 + $0x7b4] sm:$0xf]  ;;  %v2895_v20 = vor.u32 %v3644_v15, %v2894_v14  ;;  %v3590_v27 = vld [vmem:[#allocation5 + $0x28c] sm:$0xf0]  ;;  %v2870_v28 = vld [vmem:[#allocation5 + $0x3f8] sm:$0xf] }
  0x57   :  { %1947 = vmatpush.bf16.msra.mxu1 %v3083_v43  ;;  %v3344_v43 = vld [vmem:[#allocation5 + $0x7c8] sm:$0xf0]  ;;  %v3638_v29 = vld [vmem:[#allocation5 + $0x40c] sm:$0xf0]  ;;  %v2462_v36 = vld [vmem:[#allocation5 + $0xc8] sm:$0xf] }
  0x58   :  { %1961 = vmatpush.bf16.msra.mxu2 %v3275_v44  ;;  %v2771_v44 = vor.u32 %v3610_v33, %v2768_v34  ;;  %v3347_v52 = vor.u32 %v3754_v42, %v3344_v43  ;;  %v2679_v33 = vor.u32 %v3590_v27, %v2678_v25  ;;  %v2871_v34 = vor.u32 %v3638_v29, %v2870_v28  ;;  %v2654_v38 = vld [vmem:[#allocation5 + $0x248] sm:$0xf]  ;;  %v3632_v43 = vld [vmem:[#allocation5 + $0x3dc] sm:$0xf0]  ;;  %v2438_v49 = vld [vmem:[#allocation5 + $0x98] sm:$0xf] }
  0x59   :  { %1975 = vmatpush.bf16.msra.mxu3 %v3467_v48  ;;  %v3155_v48 = vor.u32 %v3706_v40, %v3152_v41  ;;  %v3584_v41 = vld [vmem:[#allocation5 + $0x25c] sm:$0xf0]  ;;  %v2846_v42 = vld [vmem:[#allocation5 + $0x3c8] sm:$0xf]  ;;  %v3530_v50 = vld [vmem:[#allocation5 + $0xac] sm:$0xf0] }
  0x5a   :  { %1934 = vmatpush.bf16.msra.mxu0 %v2867_v54  ;;  %v3748_v54 = vld [vmem:[#allocation5 + $0x784] sm:$0xf]  ;;  %v3680_v45 = vld [vmem:[#allocation5 + $0x55c] sm:$0xf0]  ;;  %v2630_v51 = vld [vmem:[#allocation5 + $0x218] sm:$0xf] }
  0x5b   :  { %1948 = vmatpush.bf16.msra.mxu1 %v3059_v55  ;;  %v3320_v55 = vld [vmem:[#allocation5 + $0x798] sm:$0xf0]  ;;  %v3578_v53 = vld [vmem:[#allocation5 + $0x22c] sm:$0xf0]  ;;  %v2414_v62 = vld [vmem:[#allocation5 + $0x68] sm:$0xf] }
  0x5c   :  { %1962 = vmatpush.bf16.msra.mxu2 %v3251_v56  ;;  %v2534_v56 = vld [vmem:[#allocation5 + $0x158] sm:$0xf]  ;;  %v3524_v63 = vld [vmem:[#allocation5 + $0x7c] sm:$0xf0]  ;;  %v3566_v15 = vld [vmem:[#allocation5 + $0x1cc] sm:$0xf0] }
  0x5d   :  { %1976 = vmatpush.bf16.msra.mxu3 %v3443_v61  ;;  %v3602_v61 = vld [vmem:[#allocation5 + $0x2ec] sm:$0xf0]  ;;  %v2390_v11 = vld [vmem:[#allocation5 + $0x38] sm:$0xf]  ;;  %v2558_v27 = vld [vmem:[#allocation5 + $0x188] sm:$0xf] }
  0x5e   :  { %1935 = vmatpush.bf16.msra.mxu0 %v2843_v3  ;;  %v3698_v3 = vld [vmem:[#allocation5 + $0x5ec] sm:$0xf0]  ;;  %v2727_v7 = vor.u32 %v3602_v61, %v2726_v59  ;;  %v2439_v59 = vor.u32 %v3530_v50, %v2438_v49  ;;  %v2582_v13 = vld [vmem:[#allocation5 + $0x1b8] sm:$0xf]  ;;  %v3560_v28 = vld [vmem:[#allocation5 + $0x19c] sm:$0xf0] }
  0x5f   :  { %1949 = vmatpush.bf16.msra.mxu1 %v3035_v4  ;;  %v3323_v4 = vor.u32 %v3748_v54, %v3320_v55  ;;  %v3111_v12 = vor.u32 %v3698_v3, %v3110_v2  ;;  %v2822_v54 = vld [vmem:[#allocation5 + $0x398] sm:$0xf]  ;;  %v3626_v55 = vld [vmem:[#allocation5 + $0x3ac] sm:$0xf0]  ;;  %v3572_v2 = vld [vmem:[#allocation5 + $0x1fc] sm:$0xf0]  ;;  %v2583_v25 = vor.u32 %v3566_v15, %v2582_v13 }
  0x60   :  { %1963 = vmatpush.bf16.msra.mxu2 %v3227_v5  ;;  %v2535_v5 = vor.u32 %v3554_v58, %v2534_v56  ;;  %v3014_v56 = vld [vmem:[#allocation5 + $0x518] sm:$0xf]  ;;  %v3674_v58 = vld [vmem:[#allocation5 + $0x52c] sm:$0xf0]  ;;  %v2823_v61 = vor.u32 %v3626_v55, %v2822_v54  ;;  %v2798_v3 = vld [vmem:[#allocation5 + $0x368] sm:$0xf] }
  0x61   :  { %1977 = vmatpush.bf16.msra.mxu3 %v3419_v10  ;;  %v3548_v10 = vld [vmem:[#allocation5 + $0x13c] sm:$0xf0]  ;;  %v2750_v29 = vld [vmem:[#allocation5 + $0x308] sm:$0xf] }
  0x62   :  { %1936 = vmatpush.bf16.msra.mxu0 %v2819_v16  ;;  %v3086_v16 = vld [vmem:[#allocation5 + $0x5a8] sm:$0xf]  ;;  %v3788_v55 = vld [vmem:[#allocation5 + $0x8bc] sm:$0xf0] }
  0x63   :  { %1950 = vmatpush.bf16.msra.mxu1 %v3011_v17  ;;  %v3692_v17 = vld [vmem:[#allocation5 + $0x5bc] sm:$0xf0]  ;;  %v3230_v13 = vld [vmem:[#allocation5 + $0x6c8] sm:$0xf] }
  0x64   :  { %1964 = vmatpush.bf16.msra.mxu2 %v3203_v18  ;;  %v2511_v18 = vor.u32 %v3548_v10, %v2510_v9  ;;  %v3087_v26 = vor.u32 %v3692_v17, %v3086_v16  ;;  %v2774_v16 = vld [vmem:[#allocation5 + $0x338] sm:$0xf]  ;;  %v3614_v17 = vld [vmem:[#allocation5 + $0x34c] sm:$0xf0]  ;;  %v3422_v15 = vld [vmem:[#allocation5 + $0x848] sm:$0xf] }
  0x65   :  { %1978 = vmatpush.bf16.msra.mxu3 %v3395_v24  ;;  %v3542_v24 = vld [vmem:[#allocation5 + $0x10c] sm:$0xf0] }
  0x66   :  { %1937 = vmatpush.bf16.msra.mxu0 %v2795_v30  ;;  %v3062_v30 = vld [vmem:[#allocation5 + $0x578] sm:$0xf] }
  0x67   :  { %1951 = vmatpush.bf16.msra.mxu1 %v2987_v31  ;;  %v3686_v31 = vld [vmem:[#allocation5 + $0x58c] sm:$0xf0] }
  0x68   :  { %1965 = vmatpush.bf16.msra.mxu2 %v3179_v32  ;;  %v2487_v32 = vor.u32 %v3542_v24, %v2486_v21  ;;  %v3063_v40 = vor.u32 %v3686_v31, %v3062_v30  ;;  %v2366_v21 = vld [vmem:[#allocation5 + $0x8] sm:$0xf]  ;;  %v3512_v24 = vld [vmem:[#allocation5 + $0x1c] sm:$0xf0] }
  0x69   :  { %1979 = vmatpush.bf16.msra.mxu3 %v3371_v37  ;;  %v3536_v37 = vld [vmem:[#allocation5 + $0xdc] sm:$0xf0] }
  0x6a   :  { %1938 = vmatpush.bf16.msra.mxu0 %v2771_v44  ;;  %v3038_v44 = vld [vmem:[#allocation5 + $0x548] sm:$0xf]  ;;  %v2463_v46 = vor.u32 %v3536_v37, %v2462_v36  ;;  %v3608_v31 = vld [vmem:[#allocation5 + $0x31c] sm:$0xf0]  ;;  %v3746_v36 = vld [vmem:[#allocation5 + $0x76c] sm:$0xf0] }
  0x6b   :  { %1952 = vmatpush.bf16.msra.mxu1 %v2963_v47  ;;  %v2655_v47 = vor.u32 %v3584_v41, %v2654_v38  ;;  %v3494_v37 = vld [vmem:[#allocation5 + $0x8d8] sm:$0xf]  ;;  %v2367_v38 = vor.u32 %v3512_v24, %v2366_v21  ;;  %v3551_v41 = vld [vmem:[#allocation5 + $0x15c] sm:$0xf]  ;;  %v2656_v21 = vld [vmem:[#allocation5 + $0x260] sm:$0xf0] }
  0x6c   :  { %1966 = vmatpush.bf16.msra.mxu2 %v3155_v48  ;;  %v2847_v48 = vor.u32 %v3632_v43, %v2846_v42  ;;  %v2536_v42 = vld [vmem:[#allocation5 + $0x170] sm:$0xf0]  ;;  %v2559_v43 = vor.u32 %v3560_v28, %v2558_v27  ;;  %v3206_v27 = vld [vmem:[#allocation5 + $0x698] sm:$0xf]  ;;  %v3722_v28 = vld [vmem:[#allocation5 + $0x6ac] sm:$0xf0] }
  0x6d   :  { %1980 = vmatpush.bf16.msra.mxu3 %v3347_v52  ;;  %v3039_v52 = vor.u32 %v3680_v45, %v3038_v44  ;;  %v2751_v44 = vor.u32 %v3608_v31, %v2750_v29  ;;  %v3599_v45 = vld [vmem:[#allocation5 + $0x2dc] sm:$0xf]  ;;  %v2539_v50 = vor.u32 %v3551_v41, %v2536_v42  ;;  %v3398_v29 = vld [vmem:[#allocation5 + $0x818] sm:$0xf]  ;;  %v3770_v31 = vld [vmem:[#allocation5 + $0x82c] sm:$0xf0] }
  0x6e   :  { %1939 = vmatpush.bf16.msra.mxu0 %v2747_v60  ;;  %v2631_v60 = vor.u32 %v3578_v53, %v2630_v51  ;;  %v3278_v51 = vld [vmem:[#allocation5 + $0x728] sm:$0xf]  ;;  %v3716_v42 = vld [vmem:[#allocation5 + $0x67c] sm:$0xf0] }
  0x6f   :  { %1953 = vmatpush.bf16.msra.mxu1 %v2939_v0  ;;  %v2606_v0 = vld [vmem:[#allocation5 + $0x1e8] sm:$0xf] }
  0x70   :  { %1967 = vmatpush.bf16.msra.mxu2 %v3131_v1  ;;  %v3015_v1 = vor.u32 %v3674_v58, %v3014_v56  ;;  %v2607_v9 = vor.u32 %v3572_v2, %v2606_v0  ;;  %v3470_v53 = vld [vmem:[#allocation5 + $0x8a8] sm:$0xf]  ;;  %v3545_v56 = vld [vmem:[#allocation5 + $0x12c] sm:$0xf]  ;;  %v2512_v58 = vld [vmem:[#allocation5 + $0x140] sm:$0xf0] }
  0x71   :  { %1981 = vmatpush.bf16.msra.mxu3 %v3323_v4  ;;  %1940 = vmatmul.bf16.vlgmr.msra.gmra.mxu0 %v3953_v22  ;;  %v3620_v4 = vld [vmem:[#allocation5 + $0x37c] sm:$0xf0]  ;;  %v3254_v0 = vld [vmem:[#allocation5 + $0x6f8] sm:$0xf]  ;;  %v3182_v41 = vld [vmem:[#allocation5 + $0x668] sm:$0xf] }
  0x72   :  { %1988 = vmatpush.bf16.msrb.mxu0 %v2535_v5  ;;  %1954 = vmatmul.bf16.vlgmr.msra.gmra.mxu1 %v3955_v23  ;;  %v2990_v5 = vld [vmem:[#allocation5 + $0x4e8] sm:$0xf]  ;;  %v2799_v10 = vor.u32 %v3620_v4, %v2798_v3  ;;  %v3446_v2 = vld [vmem:[#allocation5 + $0x878] sm:$0xf]  ;;  %v3782_v4 = vld [vmem:[#allocation5 + $0x88c] sm:$0xf0] }
  0x73   :  { %2002 = vmatpush.bf16.msrb.mxu1 %v2727_v7  ;;  %1968 = vmatmul.bf16.vlgmr.msra.gmra.mxu2 %v3959_v35  ;;  %v3668_v7 = vld [vmem:[#allocation5 + $0x4fc] sm:$0xf0] }
  0x74   :  { %2016 = vmatpush.bf16.msrb.mxu2 %v2919_v8  ;;  %1982 = vmatmul.bf16.vlgmr.msra.gmra.mxu3 %v3961_v39  ;;  %v2415_v8 = vor.u32 %v3524_v63, %v2414_v62  ;;  %v2991_v14 = vor.u32 %v3668_v7, %v2990_v5  ;;  %v3471_v62 = vor.u32 %v3788_v55, %v3470_v53  ;;  %v3539_v5 = vld [vmem:[#allocation5 + $0xfc] sm:$0xf]  ;;  %v2488_v7 = vld [vmem:[#allocation5 + $0x110] sm:$0xf0]  ;;  %v3158_v53 = vld [vmem:[#allocation5 + $0x638] sm:$0xf] }
  0x75   :  { %2030 = vmatpush.bf16.msrb.mxu3 %v3111_v12  ;;  %v3518_v12 = vld [vmem:[#allocation5 + $0x4c] sm:$0xf0]  ;;  %v2515_v63 = vor.u32 %v3545_v56, %v2512_v58  ;;  %v3350_v55 = vld [vmem:[#allocation5 + $0x7b8] sm:$0xf] }
  0x76   :  { %1989 = vmatpush.bf16.msrb.mxu0 %v2511_v18  ;;  %v2966_v18 = vld [vmem:[#allocation5 + $0x4b8] sm:$0xf]  ;;  %v3758_v58 = vld [vmem:[#allocation5 + $0x7cc] sm:$0xf0] }
  0x77   :  { %2003 = vmatpush.bf16.msrb.mxu1 %v2703_v19  ;;  %v3662_v19 = vld [vmem:[#allocation5 + $0x4cc] sm:$0xf0] }
  0x78   :  { %2017 = vmatpush.bf16.msrb.mxu2 %v2895_v20  ;;  %v2391_v20 = vor.u32 %v3518_v12, %v2390_v11  ;;  %v2967_v30 = vor.u32 %v3662_v19, %v2966_v18  ;;  %v3447_v11 = vor.u32 %v3782_v4, %v3446_v2  ;;  %v2491_v12 = vor.u32 %v3539_v5, %v2488_v7  ;;  %v3533_v18 = vld [vmem:[#allocation5 + $0xcc] sm:$0xf]  ;;  %v2464_v19 = vld [vmem:[#allocation5 + $0xe0] sm:$0xf0]  ;;  %v3326_v4 = vld [vmem:[#allocation5 + $0x788] sm:$0xf] }
  0x79   :  { %2031 = vmatpush.bf16.msrb.mxu3 %v3087_v26  ;;  %v2775_v26 = vor.u32 %v3614_v17, %v2774_v16  ;;  %v3776_v17 = vld [vmem:[#allocation5 + $0x85c] sm:$0xf0]  ;;  %v3351_v2 = vor.u32 %v3758_v58, %v3350_v55  ;;  %v3509_v7 = vld [vmem:[#allocation5 + $0xc] sm:$0xf] }
  0x7a   :  { %1990 = vmatpush.bf16.msrb.mxu0 %v2487_v32  ;;  %v2942_v32 = vld [vmem:[#allocation5 + $0x488] sm:$0xf]  ;;  %v3752_v5 = vld [vmem:[#allocation5 + $0x79c] sm:$0xf0]  ;;  %v3629_v55 = vld [vmem:[#allocation5 + $0x3cc] sm:$0xf] }
  0x7b   :  { %2004 = vmatpush.bf16.msrb.mxu1 %v2679_v33  ;;  %v3656_v33 = vld [vmem:[#allocation5 + $0x49c] sm:$0xf0]  ;;  %v3677_v58 = vld [vmem:[#allocation5 + $0x54c] sm:$0xf] }
  0x7c   :  { %2018 = vmatpush.bf16.msrb.mxu2 %v2871_v34  ;;  %v3302_v34 = vld [vmem:[#allocation5 + $0x758] sm:$0xf] }
  0x7d   :  { %2032 = vmatpush.bf16.msrb.mxu3 %v3063_v40  ;;  %v3794_v40 = vld [vmem:[#allocation5 + $0x8ec] sm:$0xf0] }
  0x7e   :  { %1991 = vmatpush.bf16.msrb.mxu0 %v2463_v46  ;;  %v2728_v46 = vld [vmem:[#allocation5 + $0x2f0] sm:$0xf0]  ;;  %v3495_v49 = vor.u32 %v3794_v40, %v3494_v37  ;;  %v3207_v37 = vor.u32 %v3722_v28, %v3206_v27 }
  0x7f   :  { %2005 = vmatpush.bf16.msrb.mxu1 %v2655_v47  ;;  %v2943_v47 = vor.u32 %v3656_v33, %v2942_v32  ;;  %v2731_v54 = vor.u32 %v3599_v45, %v2728_v46  ;;  %v3527_v32 = vld [vmem:[#allocation5 + $0x9c] sm:$0xf]  ;;  %v2440_v33 = vld [vmem:[#allocation5 + $0xb0] sm:$0xf0]  ;;  %v3764_v45 = vld [vmem:[#allocation5 + $0x7fc] sm:$0xf0] }
  0x80   :  { %2019 = vmatpush.bf16.msrb.mxu2 %v2847_v48  ;;  %v3303_v48 = vor.u32 %v3746_v36, %v3302_v34  ;;  %v3575_v34 = vld [vmem:[#allocation5 + $0x21c] sm:$0xf]  ;;  %v2632_v36 = vld [vmem:[#allocation5 + $0x230] sm:$0xf0]  ;;  %v2443_v40 = vor.u32 %v3527_v32, %v2440_v33  ;;  %v3521_v46 = vld [vmem:[#allocation5 + $0x6c] sm:$0xf] }
  0x81   :  { %2033 = vmatpush.bf16.msrb.mxu3 %v3039_v52  ;;  %v3740_v52 = vld [vmem:[#allocation5 + $0x73c] sm:$0xf0]  ;;  %v3088_v33 = vld [vmem:[#allocation5 + $0x5c0] sm:$0xf0] }
  0x82   :  { %1992 = vmatpush.bf16.msrb.mxu0 %v2439_v59  ;;  %v3593_v59 = vld [vmem:[#allocation5 + $0x2ac] sm:$0xf] }
  0x83   :  { %2006 = vmatpush.bf16.msrb.mxu1 %v2631_v60  ;;  %v2704_v60 = vld [vmem:[#allocation5 + $0x2c0] sm:$0xf0] }
  0x84   :  { %2020 = vmatpush.bf16.msrb.mxu2 %v2823_v61  ;;  %v3279_v61 = vor.u32 %v3740_v52, %v3278_v51  ;;  %v2707_v3 = vor.u32 %v3593_v59, %v2704_v60  ;;  %v3515_v59 = vld [vmem:[#allocation5 + $0x3c] sm:$0xf]  ;;  %v2392_v60 = vld [vmem:[#allocation5 + $0x50] sm:$0xf0] }
  0x85   :  { %2034 = vmatpush.bf16.msrb.mxu3 %v3015_v1  ;;  %v3734_v1 = vld [vmem:[#allocation5 + $0x70c] sm:$0xf0] }
  0x86   :  { %1993 = vmatpush.bf16.msrb.mxu0 %v2415_v8  ;;  %v3587_v8 = vld [vmem:[#allocation5 + $0x27c] sm:$0xf] }
  0x87   :  { %2007 = vmatpush.bf16.msrb.mxu1 %v2607_v9  ;;  %v2680_v9 = vld [vmem:[#allocation5 + $0x290] sm:$0xf0] }
  0x88   :  { %2021 = vmatpush.bf16.msrb.mxu2 %v2799_v10  ;;  %v3255_v10 = vor.u32 %v3734_v1, %v3254_v0  ;;  %v2683_v16 = vor.u32 %v3587_v8, %v2680_v9  ;;  %v3134_v0 = vld [vmem:[#allocation5 + $0x608] sm:$0xf]  ;;  %v3704_v1 = vld [vmem:[#allocation5 + $0x61c] sm:$0xf0]  ;;  %v2368_v9 = vld [vmem:[#allocation5 + $0x20] sm:$0xf0] }
  0x89   :  { %2035 = vmatpush.bf16.msrb.mxu3 %v2991_v14  ;;  %v3728_v14 = vld [vmem:[#allocation5 + $0x6dc] sm:$0xf0] }
  0x8a   :  { %1994 = vmatpush.bf16.msrb.mxu0 %v2391_v20  ;;  %v3581_v20 = vld [vmem:[#allocation5 + $0x24c] sm:$0xf]  ;;  %v3231_v24 = vor.u32 %v3728_v14, %v3230_v13  ;;  %v2920_v13 = vld [vmem:[#allocation5 + $0x470] sm:$0xf0]  ;;  %v3695_v14 = vld [vmem:[#allocation5 + $0x5dc] sm:$0xf] }
  0x8b   :  { %2008 = vmatpush.bf16.msrb.mxu1 %v2583_v25  ;;  %v3423_v25 = vor.u32 %v3776_v17, %v3422_v15  ;;  %v3135_v15 = vor.u32 %v3704_v1, %v3134_v0  ;;  %v3743_v17 = vld [vmem:[#allocation5 + $0x75c] sm:$0xf]  ;;  %v3424_v0 = vld [vmem:[#allocation5 + $0x860] sm:$0xf0] }
  0x8c   :  { %2022 = vmatpush.bf16.msrb.mxu2 %v2775_v26  ;;  %v2467_v26 = vor.u32 %v3533_v18, %v2464_v19  ;;  %v3304_v18 = vld [vmem:[#allocation5 + $0x770] sm:$0xf0]  ;;  %v3327_v19 = vor.u32 %v3752_v5, %v3326_v4  ;;  %v3623_v4 = vld [vmem:[#allocation5 + $0x39c] sm:$0xf] }
  0x8d   :  { %2036 = vmatpush.bf16.msrb.mxu3 %v2967_v30  ;;  %v2659_v30 = vor.u32 %v3581_v20, %v2656_v21  ;;  %v2371_v20 = vor.u32 %v3509_v7, %v2368_v9  ;;  %v3791_v21 = vld [vmem:[#allocation5 + $0x8dc] sm:$0xf]  ;;  %v3307_v28 = vor.u32 %v3743_v17, %v3304_v18  ;;  %v2824_v5 = vld [vmem:[#allocation5 + $0x3b0] sm:$0xf0]  ;;  %v2800_v18 = vld [vmem:[#allocation5 + $0x380] sm:$0xf0] }
  0x8e   :  { %1995 = vmatpush.bf16.msrb.mxu0 %v2367_v38  ;;  %v3399_v38 = vor.u32 %v3770_v31, %v3398_v29  ;;  %v3641_v29 = vld [vmem:[#allocation5 + $0x42c] sm:$0xf]  ;;  %v3671_v7 = vld [vmem:[#allocation5 + $0x51c] sm:$0xf]  ;;  %v3016_v9 = vld [vmem:[#allocation5 + $0x530] sm:$0xf0] }
  0x8f   :  { %2009 = vmatpush.bf16.msrb.mxu1 %v2559_v43  ;;  %v3374_v43 = vld [vmem:[#allocation5 + $0x7e8] sm:$0xf]  ;;  %v3689_v31 = vld [vmem:[#allocation5 + $0x5ac] sm:$0xf] }
  0x90   :  { %2023 = vmatpush.bf16.msrb.mxu2 %v2751_v44  ;;  %v2635_v44 = vor.u32 %v3575_v34, %v2632_v36  ;;  %v3375_v51 = vor.u32 %v3764_v45, %v3374_v43  ;;  %v3737_v34 = vld [vmem:[#allocation5 + $0x72c] sm:$0xf]  ;;  %v3280_v36 = vld [vmem:[#allocation5 + $0x740] sm:$0xf0]  ;;  %v3635_v43 = vld [vmem:[#allocation5 + $0x3fc] sm:$0xf] }
  0x91   :  { %2037 = vmatpush.bf16.msrb.mxu3 %v2943_v47  ;;  %1996 = vmatmul.bf16.vlgmr.msrb.gmra.mxu0 %v3947_v57  ;;  %v2416_v47 = vld [vmem:[#allocation5 + $0x80] sm:$0xf0]  ;;  %v3683_v45 = vld [vmem:[#allocation5 + $0x57c] sm:$0xf] }
  0x92   :  { %2044 = vmatpush.bf16.msra.mxu0 %v3303_v48  ;;  %2010 = vmatmul.bf16.vlgmr.msrb.gmra.mxu1 %v3950_v6  ;;  %v3569_v48 = vld [vmem:[#allocation5 + $0x1ec] sm:$0xf]  ;;  %v2419_v52 = vor.u32 %v3521_v46, %v2416_v47  ;;  %v3064_v47 = vld [vmem:[#allocation5 + $0x590] sm:$0xf0] }
  0x93   :  { %2058 = vmatpush.bf16.msra.mxu1 %v3495_v49  ;;  %2024 = vmatmul.bf16.vlgmr.msrb.gmra.mxu2 %v3953_v22  ;;  %v2608_v49 = vld [vmem:[#allocation5 + $0x200] sm:$0xf0] }
  0x94   :  { %2072 = vmatpush.bf16.msra.mxu2 %v2539_v50  ;;  %2038 = vmatmul.bf16.vlgmr.msrb.gmra.mxu3 %v3955_v23  ;;  %v3183_v50 = vor.u32 %v3716_v42, %v3182_v41  ;;  %v2611_v56 = vor.u32 %v3569_v48, %v2608_v49  ;;  %v3091_v41 = vor.u32 %v3689_v31, %v3088_v33  ;;  %v3731_v48 = vld [vmem:[#allocation5 + $0x6fc] sm:$0xf]  ;;  %v3256_v49 = vld [vmem:[#allocation5 + $0x710] sm:$0xf0] }
  0x95   :  { %2086 = vmatpush.bf16.msra.mxu3 %v2731_v54  ;;  %v3710_v54 = vld [vmem:[#allocation5 + $0x64c] sm:$0xf0]  ;;  %v3283_v42 = vor.u32 %v3737_v34, %v3280_v36  ;;  %v2776_v36 = vld [vmem:[#allocation5 + $0x350] sm:$0xf0] }
  0x96   :  { %2045 = vmatpush.bf16.msra.mxu0 %v3279_v61  ;;  %v3563_v61 = vld [vmem:[#allocation5 + $0x1bc] sm:$0xf] }
  0x97   :  { %2059 = vmatpush.bf16.msra.mxu1 %v3471_v62  ;;  %v2584_v62 = vld [vmem:[#allocation5 + $0x1d0] sm:$0xf0] }
  0x98   :  { %2073 = vmatpush.bf16.msra.mxu2 %v2515_v63  ;;  %v3159_v63 = vor.u32 %v3710_v54, %v3158_v53  ;;  %v2587_v8 = vor.u32 %v3563_v61, %v2584_v62  ;;  %v3067_v53 = vor.u32 %v3683_v45, %v3064_v47  ;;  %v3259_v54 = vor.u32 %v3731_v48, %v3256_v49  ;;  %v3725_v61 = vld [vmem:[#allocation5 + $0x6cc] sm:$0xf]  ;;  %v3232_v62 = vld [vmem:[#allocation5 + $0x6e0] sm:$0xf0]  ;;  %v3352_v45 = vld [vmem:[#allocation5 + $0x7d0] sm:$0xf0] }
  0x99   :  { %2087 = vmatpush.bf16.msra.mxu3 %v2707_v3  ;;  %v2395_v3 = vor.u32 %v3515_v59, %v2392_v60  ;;  %v3040_v60 = vld [vmem:[#allocation5 + $0x560] sm:$0xf0]  ;;  %v3605_v47 = vld [vmem:[#allocation5 + $0x30c] sm:$0xf] }
  0x9a   :  { %2046 = vmatpush.bf16.msra.mxu0 %v3255_v10  ;;  %v3557_v10 = vld [vmem:[#allocation5 + $0x18c] sm:$0xf]  ;;  %v2752_v48 = vld [vmem:[#allocation5 + $0x320] sm:$0xf0] }
  0x9b   :  { %2060 = vmatpush.bf16.msra.mxu1 %v3447_v11  ;;  %v2560_v11 = vld [vmem:[#allocation5 + $0x1a0] sm:$0xf0] }
  0x9c   :  { %2074 = vmatpush.bf16.msra.mxu2 %v2491_v12  ;;  %v3647_v12 = vld [vmem:[#allocation5 + $0x45c] sm:$0xf] }
  0x9d   :  { %2088 = vmatpush.bf16.msra.mxu3 %v2683_v16  ;;  %v3112_v16 = vld [vmem:[#allocation5 + $0x5f0] sm:$0xf0] }
  0x9e   :  { %2047 = vmatpush.bf16.msra.mxu0 %v3231_v24  ;;  %v3496_v24 = vld [vmem:[#allocation5 + $0x8f0] sm:$0xf0]  ;;  %v3115_v27 = vor.u32 %v3695_v14, %v3112_v16  ;;  %v2827_v14 = vor.u32 %v3623_v4, %v2824_v5  ;;  %v3019_v16 = vor.u32 %v3671_v7, %v3016_v9  ;;  %v3118_v5 = vld [vmem:[#allocation5 + $0x5e0] sm:$0xf]  ;;  %v3699_v7 = vld [vmem:[#allocation5 + $0x5f4] sm:$0xf0] }
  0x9f   :  { %2061 = vmatpush.bf16.msra.mxu1 %v3423_v25  ;;  %v2563_v25 = vor.u32 %v3557_v10, %v2560_v11  ;;  %v3499_v32 = vor.u32 %v3791_v21, %v3496_v24  ;;  %v3719_v10 = vld [vmem:[#allocation5 + $0x69c] sm:$0xf]  ;;  %v3208_v11 = vld [vmem:[#allocation5 + $0x6b0] sm:$0xf0]  ;;  %v3713_v24 = vld [vmem:[#allocation5 + $0x66c] sm:$0xf] }
  0xa0   :  { %2075 = vmatpush.bf16.msra.mxu2 %v2467_v26  ;;  %v2923_v26 = vor.u32 %v3647_v12, %v2920_v13  ;;  %v3767_v12 = vld [vmem:[#allocation5 + $0x81c] sm:$0xf]  ;;  %v3400_v13 = vld [vmem:[#allocation5 + $0x830] sm:$0xf0]  ;;  %v3211_v17 = vor.u32 %v3719_v10, %v3208_v11 }
  0xa1   :  { %2089 = vmatpush.bf16.msra.mxu3 %v2659_v30  ;;  %v2896_v30 = vld [vmem:[#allocation5 + $0x440] sm:$0xf0]  ;;  %v3403_v21 = vor.u32 %v3767_v12, %v3400_v13 }
  0xa2   :  { %2048 = vmatpush.bf16.msra.mxu0 %v3207_v37  ;;  %v3785_v37 = vld [vmem:[#allocation5 + $0x8ac] sm:$0xf] }
  0xa3   :  { %2062 = vmatpush.bf16.msra.mxu1 %v3399_v38  ;;  %v3472_v38 = vld [vmem:[#allocation5 + $0x8c0] sm:$0xf0] }
  0xa4   :  { %2076 = vmatpush.bf16.msra.mxu2 %v2443_v40  ;;  %v2899_v40 = vor.u32 %v3641_v29, %v2896_v30  ;;  %v3475_v46 = vor.u32 %v3785_v37, %v3472_v38  ;;  %v3611_v30 = vld [vmem:[#allocation5 + $0x33c] sm:$0xf] }
  0xa5   :  { %2090 = vmatpush.bf16.msra.mxu3 %v2635_v44  ;;  %v2872_v44 = vld [vmem:[#allocation5 + $0x410] sm:$0xf0]  ;;  %v3659_v37 = vld [vmem:[#allocation5 + $0x4bc] sm:$0xf] }
  0xa6   :  { %2049 = vmatpush.bf16.msra.mxu0 %v3183_v50  ;;  %v3779_v50 = vld [vmem:[#allocation5 + $0x87c] sm:$0xf] }
  0xa7   :  { %2063 = vmatpush.bf16.msra.mxu1 %v3375_v51  ;;  %v3448_v51 = vld [vmem:[#allocation5 + $0x890] sm:$0xf0] }
  0xa8   :  { %2077 = vmatpush.bf16.msra.mxu2 %v2419_v52  ;;  %v2875_v52 = vor.u32 %v3635_v43, %v2872_v44  ;;  %v3451_v59 = vor.u32 %v3779_v50, %v3448_v51  ;;  %v3755_v44 = vld [vmem:[#allocation5 + $0x7bc] sm:$0xf]  ;;  %v3653_v51 = vld [vmem:[#allocation5 + $0x48c] sm:$0xf] }
  0xa9   :  { %2091 = vmatpush.bf16.msra.mxu3 %v2611_v56  ;;  %v2848_v56 = vld [vmem:[#allocation5 + $0x3e0] sm:$0xf0] }
  0xaa   :  { %2050 = vmatpush.bf16.msra.mxu0 %v3159_v63  ;;  %v3773_v63 = vld [vmem:[#allocation5 + $0x84c] sm:$0xf]  ;;  %v2851_v1 = vor.u32 %v3629_v55, %v2848_v56  ;;  %v3355_v55 = vor.u32 %v3755_v44, %v3352_v45  ;;  %v3136_v56 = vld [vmem:[#allocation5 + $0x620] sm:$0xf0]  ;;  %v3687_v44 = vld [vmem:[#allocation5 + $0x594] sm:$0xf0] }
  0xab   :  { %2064 = vmatpush.bf16.msra.mxu1 %v3351_v2  ;;  %v3043_v2 = vor.u32 %v3677_v58, %v3040_v60  ;;  %v3749_v58 = vld [vmem:[#allocation5 + $0x78c] sm:$0xf]  ;;  %v2542_v60 = vld [vmem:[#allocation5 + $0x160] sm:$0xf] }
  0xac   :  { %2078 = vmatpush.bf16.msra.mxu2 %v2395_v3  ;;  %v3235_v3 = vor.u32 %v3725_v61, %v3232_v62  ;;  %v3555_v61 = vld [vmem:[#allocation5 + $0x174] sm:$0xf0]  ;;  %v2734_v62 = vld [vmem:[#allocation5 + $0x2e0] sm:$0xf] }
  0xad   :  { %2092 = vmatpush.bf16.msra.mxu3 %v2587_v8  ;;  %v3427_v8 = vor.u32 %v3773_v63, %v3424_v0  ;;  %v2755_v63 = vor.u32 %v3605_v47, %v2752_v48  ;;  %v3603_v0 = vld [vmem:[#allocation5 + $0x2f4] sm:$0xf0]  ;;  %v2543_v11 = vor.u32 %v3555_v61, %v2542_v60  ;;  %v3046_v60 = vld [vmem:[#allocation5 + $0x550] sm:$0xf]  ;;  %v3681_v61 = vld [vmem:[#allocation5 + $0x564] sm:$0xf0] }
  0xae   :  { %2051 = vmatpush.bf16.msra.mxu0 %v3135_v15  ;;  %v3617_v15 = vld [vmem:[#allocation5 + $0x36c] sm:$0xf]  ;;  %v1829_v34 = vpop.f32.mrf.mxu0  ;;  %v2735_v12 = vor.u32 %v3603_v0, %v2734_v62 }
  0xaf   :  { %2065 = vmatpush.bf16.msra.mxu1 %v3327_v19  ;;  %v3665_v19 = vld [vmem:[#allocation5 + $0x4ec] sm:$0xf]  ;;  %v2803_v29 = vor.u32 %v3617_v15, %v2800_v18  ;;  %v1843_v43 = vpop.f32.mrf.mxu1  ;;  %v2518_v15 = vld [vmem:[#allocation5 + $0x130] sm:$0xf]  ;;  %v3119_v18 = vor.u32 %v3699_v7, %v3118_v5  ;;  %v3531_v5 = vld [vmem:[#allocation5 + $0xb4] sm:$0xf0] }
  0xb0   :  { %2079 = vmatpush.bf16.msra.mxu2 %v2371_v20  ;;  %v2992_v20 = vld [vmem:[#allocation5 + $0x500] sm:$0xf0]  ;;  %v2638_v7 = vld [vmem:[#allocation5 + $0x220] sm:$0xf] }
  0xb1   :  { %2093 = vmatpush.bf16.msra.mxu3 %v2563_v25  ;;  %2052 = vmatmul.bf16.vlgmr.msra.gmra.mxu0 %v3959_v35  ;;  %v3184_v25 = vld [vmem:[#allocation5 + $0x680] sm:$0xf0]  ;;  %v2995_v31 = vor.u32 %v3665_v19, %v2992_v20  ;;  %v3597_v19 = vld [vmem:[#allocation5 + $0x2c4] sm:$0xf0]  ;;  %v2902_v20 = vld [vmem:[#allocation5 + $0x430] sm:$0xf] }
  0xb2   :  { %2100 = vmatpush.bf16.msrb.mxu0 %v2923_v26  ;;  %2066 = vmatmul.bf16.vlgmr.msra.gmra.mxu1 %v3961_v39  ;;  %v3979_v26 = vld [vmem:[#allocation7] sm:$0x3f] }
  0xb3   :  { %2114 = vmatpush.bf16.msrb.mxu1 %v3115_v27  ;;  %2080 = vmatmul.bf16.vlgmr.msra.gmra.mxu2 %v3947_v57  ;;  %v3761_v27 = vld [vmem:[#allocation5 + $0x7ec] sm:$0xf]  ;;  %v368_v33 = vperm.slane %v3979_v26, 0 }
  0xb4   :  { %2128 = vmatpush.bf16.msrb.mxu2 %v3307_v28  ;;  %2094 = vmatmul.bf16.vlgmr.msra.gmra.mxu3 %v3950_v6  ;;  %v3376_v28 = vld [vmem:[#allocation5 + $0x800] sm:$0xf0] }
  0xb5   :  { %2142 = vmatpush.bf16.msrb.mxu3 %v3499_v32  ;;  %v3187_v32 = vor.u32 %v3713_v24, %v3184_v25  ;;  %v3379_v38 = vor.u32 %v3761_v27, %v3376_v28  ;;  %v3094_v25 = vld [vmem:[#allocation5 + $0x5b0] sm:$0xf]  ;;  %v3693_v27 = vld [vmem:[#allocation5 + $0x5c4] sm:$0xf0] }
  0xb6   :  { %2101 = vmatpush.bf16.msrb.mxu0 %v2899_v40  ;;  %v2968_v40 = vld [vmem:[#allocation5 + $0x4d0] sm:$0xf0] }
  0xb7   :  { %2115 = vmatpush.bf16.msrb.mxu1 %v3091_v41  ;;  %v3707_v41 = vld [vmem:[#allocation5 + $0x63c] sm:$0xf]  ;;  %v2971_v49 = vor.u32 %v3659_v37, %v2968_v40  ;;  %v1845_v24 = vpop.f32.mrf.mxu1  ;;  %v1871_v28 = vpop.f32.mrf.mxu3  ;;  %v3543_v37 = vld [vmem:[#allocation5 + $0x114] sm:$0xf0]  ;;  %v3095_v40 = vor.u32 %v3693_v27, %v3094_v25  ;;  %v3573_v27 = vld [vmem:[#allocation5 + $0x204] sm:$0xf0] }
  0xb8   :  { %2129 = vmatpush.bf16.msrb.mxu2 %v3283_v42  ;;  %v3160_v42 = vld [vmem:[#allocation5 + $0x650] sm:$0xf0] }
  0xb9   :  { %2143 = vmatpush.bf16.msrb.mxu3 %v3475_v46  ;;  %v2779_v46 = vor.u32 %v3611_v30, %v2776_v36  ;;  %v3163_v50 = vor.u32 %v3707_v41, %v3160_v42  ;;  %v2494_v36 = vld [vmem:[#allocation5 + $0x100] sm:$0xf]  ;;  %v3591_v41 = vld [vmem:[#allocation5 + $0x294] sm:$0xf0] }
  0xba   :  { %2102 = vmatpush.bf16.msrb.mxu0 %v2875_v52  ;;  %v2944_v52 = vld [vmem:[#allocation5 + $0x4a0] sm:$0xf0]  ;;  %v2878_v42 = vld [vmem:[#allocation5 + $0x400] sm:$0xf] }
  0xbb   :  { %2116 = vmatpush.bf16.msrb.mxu1 %v3067_v53  ;;  %v3701_v53 = vld [vmem:[#allocation5 + $0x60c] sm:$0xf] }
  0xbc   :  { %2130 = vmatpush.bf16.msrb.mxu2 %v3259_v54  ;;  %v1830_v54 = vadd.f32 %v1829_v34, %v368_v33  ;;  %v3139_v4 = vor.u32 %v3701_v53, %v3136_v56  ;;  %v2854_v56 = vld [vmem:[#allocation5 + $0x3d0] sm:$0xf] }
  0xbd   :  { %2144 = vmatpush.bf16.msrb.mxu3 %v3451_v59  ;;  %v3328_v59 = vld [vmem:[#allocation5 + $0x7a0] sm:$0xf0] }
  0xbe   :  { %2103 = vmatpush.bf16.msrb.mxu0 %v2851_v1  ;;  %v2926_v1 = vld [vmem:[#allocation5 + $0x460] sm:$0xf]  ;;  %v1844_v9 = vadd.f32 %v1843_v43, %v1830_v54  ;;  %v3331_v10 = vor.u32 %v3749_v58, %v3328_v59  ;;  %v3639_v43 = vld [vmem:[#allocation5 + $0x414] sm:$0xf0]  ;;  %v3633_v58 = vld [vmem:[#allocation5 + $0x3e4] sm:$0xf0] }
  0xbf   :  { %2117 = vmatpush.bf16.msrb.mxu1 %v3043_v2  ;;  %v3651_v2 = vld [vmem:[#allocation5 + $0x474] sm:$0xf0] }
  0xc0   :  { %2131 = vmatpush.bf16.msrb.mxu2 %v3235_v3  ;;  %v2947_v3 = vor.u32 %v3653_v51, %v2944_v52  ;;  %v2927_v13 = vor.u32 %v3651_v2, %v2926_v1  ;;  %v3537_v51 = vld [vmem:[#allocation5 + $0xe4] sm:$0xf0]  ;;  %v2662_v52 = vld [vmem:[#allocation5 + $0x250] sm:$0xf] }
  0xc1   :  { %2145 = vmatpush.bf16.msrb.mxu3 %v3427_v8  ;;  %v1857_v8 = vpop.f32.mrf.mxu2 }
  0xc2   :  { %2104 = vmatpush.bf16.msrb.mxu0 %v2827_v14  ;;  %v1831_v14 = vpop.f32.mrf.mxu0 }
  0xc3   :  { %2118 = vmatpush.bf16.msrb.mxu1 %v3019_v16  ;;  %v3549_v16 = vld [vmem:[#allocation5 + $0x144] sm:$0xf0] }
  0xc4   :  { %2132 = vmatpush.bf16.msrb.mxu2 %v3211_v17  ;;  %v2710_v17 = vld [vmem:[#allocation5 + $0x2b0] sm:$0xf]  ;;  %v2519_v30 = vor.u32 %v3549_v16, %v2518_v15  ;;  %v3675_v15 = vld [vmem:[#allocation5 + $0x534] sm:$0xf0] }
  0xc5   :  { %2146 = vmatpush.bf16.msrb.mxu3 %v3403_v21  ;;  %v3645_v21 = vld [vmem:[#allocation5 + $0x444] sm:$0xf0] }
  0xc6   :  { %2105 = vmatpush.bf16.msrb.mxu0 %v2803_v29  ;;  %v1832_v29 = vadd.f32 %v1831_v14, %v368_v33  ;;  %v2903_v34 = vor.u32 %v3645_v21, %v2902_v20  ;;  %v3070_v33 = vld [vmem:[#allocation5 + $0x580] sm:$0xf]  ;;  %v2422_v20 = vld [vmem:[#allocation5 + $0x70] sm:$0xf]  ;;  %v3525_v21 = vld [vmem:[#allocation5 + $0x84] sm:$0xf0] }
  0xc7   :  { %2119 = vmatpush.bf16.msrb.mxu1 %v2995_v31  ;;  %v1858_v31 = vadd.f32 %v1857_v8, %v1844_v9  ;;  %v3071_v54 = vor.u32 %v3687_v44, %v3070_v33  ;;  %v1873_v8 = vpop.f32.mrf.mxu3  ;;  %v3047_v9 = vor.u32 %v3681_v61, %v3046_v60  ;;  %v3022_v14 = vld [vmem:[#allocation5 + $0x520] sm:$0xf]  ;;  %v3609_v60 = vld [vmem:[#allocation5 + $0x324] sm:$0xf0]  ;;  %v2950_v61 = vld [vmem:[#allocation5 + $0x490] sm:$0xf] }
  0xc8   :  { %2133 = vmatpush.bf16.msrb.mxu2 %v3187_v32  ;;  %v2711_v32 = vor.u32 %v3597_v19, %v2710_v17  ;;  %v1846_v45 = vadd.f32 %v1845_v24, %v1832_v29  ;;  %v2614_v24 = vld [vmem:[#allocation5 + $0x1f0] sm:$0xf]  ;;  %v3023_v25 = vor.u32 %v3675_v15, %v3022_v14  ;;  %v3621_v29 = vld [vmem:[#allocation5 + $0x384] sm:$0xf0]  ;;  %v369_v15 = vperm.slane %v3979_v26, 1 }
  0xc9   :  { %2147 = vmatpush.bf16.msrb.mxu3 %v3379_v38  ;;  %v2686_v38 = vld [vmem:[#allocation5 + $0x280] sm:$0xf]  ;;  %v1872_v47 = vadd.f32 %v1871_v28, %v1858_v31  ;;  %v1859_v53 = vpop.f32.mrf.mxu2  ;;  %v2806_v28 = vld [vmem:[#allocation5 + $0x370] sm:$0xf] }
  0xca   :  { %2106 = vmatpush.bf16.msrb.mxu0 %v2779_v46  ;;  %v2495_v46 = vor.u32 %v3543_v37, %v2494_v36  ;;  %v2687_v48 = vor.u32 %v3591_v41, %v2686_v38  ;;  %v1860_v1 = vadd.f32 %v1859_v53, %v1846_v45  ;;  %v2998_v31 = vld [vmem:[#allocation5 + $0x4f0] sm:$0xf]  ;;  %v2423_v36 = vor.u32 %v3525_v21, %v2422_v20  ;;  %v2398_v41 = vld [vmem:[#allocation5 + $0x40] sm:$0xf]  ;;  %v3567_v45 = vld [vmem:[#allocation5 + $0x1d4] sm:$0xf0] }
  0xcb   :  { %2120 = vmatpush.bf16.msrb.mxu1 %v2971_v49  ;;  %v2879_v49 = vor.u32 %v3639_v43, %v2878_v42  ;;  %v2615_v38 = vor.u32 %v3573_v27, %v2614_v24  ;;  %v3519_v42 = vld [vmem:[#allocation5 + $0x54] sm:$0xf0]  ;;  %v2590_v43 = vld [vmem:[#allocation5 + $0x1c0] sm:$0xf]  ;;  %v3478_v20 = vld [vmem:[#allocation5 + $0x8b0] sm:$0xf] }
  0xcc   :  { %2134 = vmatpush.bf16.msrb.mxu2 %v3163_v50  ;;  %v2470_v50 = vld [vmem:[#allocation5 + $0xd0] sm:$0xf]  ;;  %v1874_v17 = vadd.f32 %v1873_v8, %v1860_v1  ;;  %v2591_v53 = vor.u32 %v3567_v45, %v2590_v43  ;;  %v3502_v1 = vld [vmem:[#allocation5 + $0x8e0] sm:$0xf]  ;;  %v3789_v24 = vld [vmem:[#allocation5 + $0x8c4] sm:$0xf0] }
  0xcd   :  { %2148 = vmatpush.bf16.msrb.mxu3 %v3355_v55  ;;  %v3585_v55 = vld [vmem:[#allocation5 + $0x264] sm:$0xf0]  ;;  %v2520_v27 = vld [vmem:[#allocation5 + $0x148] sm:$0xf0]  ;;  %v2496_v43 = vld [vmem:[#allocation5 + $0x118] sm:$0xf0] }
  0xce   :  { %2107 = vmatpush.bf16.msrb.mxu0 %v2755_v63  ;;  %v1885_v59 = vpop.f32.mrf.mxu0  ;;  %v2471_v63 = vor.u32 %v3537_v51, %v2470_v50  ;;  %v2663_v2 = vor.u32 %v3585_v55, %v2662_v52  ;;  %v2399_v50 = vor.u32 %v3519_v42, %v2398_v41  ;;  %v2374_v51 = vld [vmem:[#allocation5 + $0x10] sm:$0xf]  ;;  %v3513_v52 = vld [vmem:[#allocation5 + $0x24] sm:$0xf0]  ;;  %v3783_v41 = vld [vmem:[#allocation5 + $0x894] sm:$0xf0] }
  0xcf   :  { %2121 = vmatpush.bf16.msrb.mxu1 %v2947_v3  ;;  %v1886_v62 = vadd.f32 %v1885_v59, %v1872_v47  ;;  %v1899_v0 = vpop.f32.mrf.mxu1  ;;  %v2855_v3 = vor.u32 %v3633_v58, %v2854_v56  ;;  %v3615_v47 = vld [vmem:[#allocation5 + $0x354] sm:$0xf0]  ;;  %v2566_v55 = vld [vmem:[#allocation5 + $0x190] sm:$0xf]  ;;  %v3561_v56 = vld [vmem:[#allocation5 + $0x1a4] sm:$0xf0] }
  0xd0   :  { %2135 = vmatpush.bf16.msrb.mxu2 %v3139_v4  ;;  %v2446_v4 = vld [vmem:[#allocation5 + $0xa0] sm:$0xf]  ;;  %v2758_v58 = vld [vmem:[#allocation5 + $0x310] sm:$0xf]  ;;  %v2567_v8 = vor.u32 %v3561_v56, %v2566_v55  ;;  %v3540_v42 = vld [vmem:[#allocation5 + $0x104] sm:$0xf] }
  0xd1   :  { %2149 = vmatpush.bf16.msrb.mxu3 %v3331_v10  ;;  %2108 = vmatmul.bf16.vlgmr.msrb.gmra.mxu0 %v3953_v22  ;;  %v1900_v10 = vadd.f32 %v1899_v0, %v1886_v62  ;;  %v2447_v16 = vor.u32 %v3531_v5, %v2446_v4  ;;  %v3657_v62 = vld [vmem:[#allocation5 + $0x4a4] sm:$0xf0]  ;;  %v3747_v0 = vld [vmem:[#allocation5 + $0x774] sm:$0xf0]  ;;  %v3552_v4 = vld [vmem:[#allocation5 + $0x164] sm:$0xf] }
  0xd2   :  { %2156 = vmatpush.bf16.msra.mxu0 %v2543_v11  ;;  %2122 = vmatmul.bf16.vlgmr.msrb.gmra.mxu1 %v3955_v23  ;;  %v3579_v11 = vld [vmem:[#allocation5 + $0x234] sm:$0xf0]  ;;  %v2544_v5 = vld [vmem:[#allocation5 + $0x178] sm:$0xf0]  ;;  %v3777_v55 = vld [vmem:[#allocation5 + $0x864] sm:$0xf0] }
  0xd3   :  { %2170 = vmatpush.bf16.msra.mxu1 %v2735_v12  ;;  %2136 = vmatmul.bf16.vlgmr.msrb.gmra.mxu2 %v3959_v35  ;;  %v2830_v12 = vld [vmem:[#allocation5 + $0x3a0] sm:$0xf]  ;;  %2324 = vst [vmem:[#allocation8] sm:$0xff] %v1900_v10  ;;  %v3600_v10 = vld [vmem:[#allocation5 + $0x2e4] sm:$0xf] }
  0xd4   :  { %2184 = vmatpush.bf16.msra.mxu2 %v2927_v13  ;;  %2150 = vmatmul.bf16.vlgmr.msrb.gmra.mxu3 %v3961_v39  ;;  %v3627_v13 = vld [vmem:[#allocation5 + $0x3b4] sm:$0xf0]  ;;  %v3534_v56 = vld [vmem:[#allocation5 + $0xd4] sm:$0xf] }
  0xd5   :  { %2198 = vmatpush.bf16.msra.mxu3 %v3119_v18  ;;  %v2639_v18 = vor.u32 %v3579_v11, %v2638_v7  ;;  %v2831_v19 = vor.u32 %v3627_v13, %v2830_v12  ;;  %v2736_v11 = vld [vmem:[#allocation5 + $0x2f8] sm:$0xf0]  ;;  %v2951_v13 = vor.u32 %v3657_v62, %v2950_v61  ;;  %v2664_v61 = vld [vmem:[#allocation5 + $0x268] sm:$0xf0] }
  0xd6   :  { %2157 = vmatpush.bf16.msra.mxu0 %v2519_v30  ;;  %v1887_v30 = vpop.f32.mrf.mxu0  ;;  %v1913_v7 = vpop.f32.mrf.mxu2  ;;  %v2739_v21 = vor.u32 %v3600_v10, %v2736_v11  ;;  %v3528_v10 = vld [vmem:[#allocation5 + $0xa4] sm:$0xf]  ;;  %v2448_v11 = vld [vmem:[#allocation5 + $0xb8] sm:$0xf0] }
  0xd7   :  { %2171 = vmatpush.bf16.msra.mxu1 %v2711_v32  ;;  %v3669_v32 = vld [vmem:[#allocation5 + $0x504] sm:$0xf0]  ;;  %v1901_v37 = vpop.f32.mrf.mxu1  ;;  %v1927_v12 = vpop.f32.mrf.mxu3 }
  0xd8   :  { %2185 = vmatpush.bf16.msra.mxu2 %v2903_v34  ;;  %v1888_v34 = vadd.f32 %v1887_v30, %v1874_v17  ;;  %v2999_v33 = vor.u32 %v3669_v32, %v2998_v31  ;;  %v2547_v17 = vor.u32 %v3552_v4, %v2544_v5  ;;  %v1914_v30 = vadd.f32 %v1913_v7, %v369_v15  ;;  %v3214_v4 = vld [vmem:[#allocation5 + $0x6a0] sm:$0xf]  ;;  %v3723_v5 = vld [vmem:[#allocation5 + $0x6b4] sm:$0xf0] }
  0xd9   :  { %2199 = vmatpush.bf16.msra.mxu3 %v3095_v40  ;;  %v2807_v40 = vor.u32 %v3621_v29, %v2806_v28  ;;  %v3594_v28 = vld [vmem:[#allocation5 + $0x2b4] sm:$0xf]  ;;  %v2712_v29 = vld [vmem:[#allocation5 + $0x2c8] sm:$0xf0]  ;;  %v3479_v32 = vor.u32 %v3789_v24, %v3478_v20  ;;  %v3406_v7 = vld [vmem:[#allocation5 + $0x820] sm:$0xf] }
  0xda   :  { %2158 = vmatpush.bf16.msra.mxu0 %v2495_v46  ;;  %v1902_v44 = vadd.f32 %v1901_v37, %v1888_v34  ;;  %v2782_v46 = vld [vmem:[#allocation5 + $0x340] sm:$0xf]  ;;  %v3735_v37 = vld [vmem:[#allocation5 + $0x714] sm:$0xf0]  ;;  %v1928_v45 = vadd.f32 %v1927_v12, %v1914_v30  ;;  %v3717_v20 = vld [vmem:[#allocation5 + $0x684] sm:$0xf0] }
  0xdb   :  { %2172 = vmatpush.bf16.msra.mxu1 %v2687_v48  ;;  %v2974_v48 = vld [vmem:[#allocation5 + $0x4c0] sm:$0xf]  ;;  %v3765_v24 = vld [vmem:[#allocation5 + $0x804] sm:$0xf0] }
  0xdc   :  { %2186 = vmatpush.bf16.msra.mxu2 %v2879_v49  ;;  %v3663_v49 = vld [vmem:[#allocation5 + $0x4d4] sm:$0xf0]  ;;  %2330 = vst [vmem:[#allocation8 + $0x30] sm:$0xff] %v1902_v44  ;;  %v2688_v44 = vld [vmem:[#allocation5 + $0x298] sm:$0xf0] }
  0xdd   :  { %2200 = vmatpush.bf16.msra.mxu3 %v3071_v54  ;;  %v2783_v54 = vor.u32 %v3615_v47, %v2782_v46  ;;  %v2975_v59 = vor.u32 %v3663_v49, %v2974_v48  ;;  %v2499_v49 = vor.u32 %v3540_v42, %v2496_v43  ;;  %v3166_v43 = vld [vmem:[#allocation5 + $0x640] sm:$0xf] }
  0xde   :  { %2159 = vmatpush.bf16.msra.mxu0 %v2471_v63  ;;  %v3310_v63 = vld [vmem:[#allocation5 + $0x760] sm:$0xf]  ;;  %v1915_v47 = vpop.f32.mrf.mxu2 }
  0xdf   :  { %2173 = vmatpush.bf16.msra.mxu1 %v2663_v2  ;;  %v2375_v2 = vor.u32 %v3513_v52, %v2374_v51  ;;  %v3311_v14 = vor.u32 %v3747_v0, %v3310_v63  ;;  %v3238_v51 = vld [vmem:[#allocation5 + $0x6d0] sm:$0xf]  ;;  %v3729_v52 = vld [vmem:[#allocation5 + $0x6e4] sm:$0xf0] }
  0xe0   :  { %2187 = vmatpush.bf16.msra.mxu2 %v2855_v3  ;;  %v3795_v3 = vld [vmem:[#allocation5 + $0x8f4] sm:$0xf0]  ;;  %v3239_v63 = vor.u32 %v3729_v52, %v3238_v51  ;;  %v2592_v51 = vld [vmem:[#allocation5 + $0x1d8] sm:$0xf0] }
  0xe1   :  { %2201 = vmatpush.bf16.msra.mxu3 %v3047_v9  ;;  %v2759_v9 = vor.u32 %v3609_v60, %v2758_v58  ;;  %v2472_v58 = vld [vmem:[#allocation5 + $0xe8] sm:$0xf0]  ;;  %v3582_v60 = vld [vmem:[#allocation5 + $0x254] sm:$0xf] }
  0xe2   :  { %2160 = vmatpush.bf16.msra.mxu0 %v2447_v16  ;;  %v3503_v16 = vor.u32 %v3795_v3, %v3502_v1  ;;  %v1916_v1 = vadd.f32 %v1915_v47, %v369_v15  ;;  %v2475_v3 = vor.u32 %v3534_v56, %v2472_v58  ;;  %v3759_v47 = vld [vmem:[#allocation5 + $0x7d4] sm:$0xf0] }
  0xe3   :  { %2174 = vmatpush.bf16.msra.mxu1 %v2639_v18  ;;  %v3286_v18 = vld [vmem:[#allocation5 + $0x730] sm:$0xf] }
  0xe4   :  { %2188 = vmatpush.bf16.msra.mxu2 %v2831_v19  ;;  %v3741_v19 = vld [vmem:[#allocation5 + $0x744] sm:$0xf0] }
  0xe5   :  { %2202 = vmatpush.bf16.msra.mxu3 %v3023_v25  ;;  %v3546_v25 = vld [vmem:[#allocation5 + $0x134] sm:$0xf]  ;;  %v3287_v31 = vor.u32 %v3741_v19, %v3286_v18  ;;  %v2451_v19 = vor.u32 %v3528_v10, %v2448_v11  ;;  %v3120_v10 = vld [vmem:[#allocation5 + $0x5f8] sm:$0xf0]  ;;  %v3744_v11 = vld [vmem:[#allocation5 + $0x764] sm:$0xf] }
  0xe6   :  { %2161 = vmatpush.bf16.msra.mxu0 %v2423_v36  ;;  %v2523_v34 = vor.u32 %v3546_v25, %v2520_v27  ;;  %v3262_v36 = vld [vmem:[#allocation5 + $0x700] sm:$0xf] }
  0xe7   :  { %2175 = vmatpush.bf16.msra.mxu1 %v2615_v38  ;;  %v3454_v38 = vld [vmem:[#allocation5 + $0x880] sm:$0xf]  ;;  %v3263_v46 = vor.u32 %v3735_v37, %v3262_v36  ;;  %v2616_v36 = vld [vmem:[#allocation5 + $0x208] sm:$0xf0] }
  0xe8   :  { %2189 = vmatpush.bf16.msra.mxu2 %v2807_v40  ;;  %v2715_v40 = vor.u32 %v3594_v28, %v2712_v29  ;;  %v3455_v48 = vor.u32 %v3783_v41, %v3454_v38  ;;  %v3522_v28 = vld [vmem:[#allocation5 + $0x74] sm:$0xf]  ;;  %v2424_v29 = vld [vmem:[#allocation5 + $0x88] sm:$0xf0] }
  0xe9   :  { %2203 = vmatpush.bf16.msra.mxu3 %v2999_v33  ;;  %v3588_v33 = vld [vmem:[#allocation5 + $0x284] sm:$0xf]  ;;  %v2427_v42 = vor.u32 %v3522_v28, %v2424_v29  ;;  %v3096_v29 = vld [vmem:[#allocation5 + $0x5c8] sm:$0xf0] }
  0xea   :  { %2162 = vmatpush.bf16.msra.mxu0 %v2399_v50  ;;  %v1929_v50 = vpop.f32.mrf.mxu3 }
  0xeb   :  { %2176 = vmatpush.bf16.msra.mxu1 %v2591_v53  ;;  %v3430_v53 = vld [vmem:[#allocation5 + $0x850] sm:$0xf]  ;;  %v1930_v18 = vadd.f32 %v1929_v50, %v1916_v1  ;;  %v3564_v50 = vld [vmem:[#allocation5 + $0x1c4] sm:$0xf]  ;;  %v3558_v1 = vld [vmem:[#allocation5 + $0x194] sm:$0xf] }
  0xec   :  { %2190 = vmatpush.bf16.msra.mxu2 %v2783_v54  ;;  %v2691_v54 = vor.u32 %v3588_v33, %v2688_v44  ;;  %v3711_v33 = vld [vmem:[#allocation5 + $0x654] sm:$0xf0]  ;;  %v3358_v44 = vld [vmem:[#allocation5 + $0x7c0] sm:$0xf] }
  0xed   :  { %2204 = vmatpush.bf16.msra.mxu3 %v2975_v59  ;;  %v3167_v52 = vor.u32 %v3711_v33, %v3166_v43  ;;  %v3359_v56 = vor.u32 %v3759_v47, %v3358_v44  ;;  %v3072_v33 = vld [vmem:[#allocation5 + $0x598] sm:$0xf0]  ;;  %v3732_v44 = vld [vmem:[#allocation5 + $0x704] sm:$0xf] }
  0xee   :  { %2163 = vmatpush.bf16.msra.mxu0 %v2375_v2  ;;  %v1941_v59 = vpop.f32.mrf.mxu0  ;;  %v3431_v2 = vor.u32 %v3777_v55, %v3430_v53  ;;  %v3142_v53 = vld [vmem:[#allocation5 + $0x610] sm:$0xf]  ;;  %v3456_v47 = vld [vmem:[#allocation5 + $0x898] sm:$0xf0] }
  0xef   :  { %2177 = vmatpush.bf16.msra.mxu1 %v2567_v8  ;;  %v1942_v62 = vadd.f32 %v1941_v59, %v1928_v45  ;;  %v1955_v0 = vpop.f32.mrf.mxu1  ;;  %v2667_v8 = vor.u32 %v3582_v60, %v2664_v61  ;;  %v3334_v59 = vld [vmem:[#allocation5 + $0x790] sm:$0xf]  ;;  %v3753_v60 = vld [vmem:[#allocation5 + $0x7a4] sm:$0xf0]  ;;  %v3510_v61 = vld [vmem:[#allocation5 + $0x14] sm:$0xf] }
  0xf0   :  { %2191 = vmatpush.bf16.msra.mxu2 %v2759_v9  ;;  %v3771_v9 = vld [vmem:[#allocation5 + $0x834] sm:$0xf0] }
  0xf1   :  { %2205 = vmatpush.bf16.msra.mxu3 %v2951_v13  ;;  %2164 = vmatmul.bf16.vlgmr.msra.gmra.mxu0 %v3947_v57  ;;  %v1956_v12 = vadd.f32 %v1955_v0, %v1942_v62  ;;  %v3576_v13 = vld [vmem:[#allocation5 + $0x224] sm:$0xf]  ;;  %v3407_v15 = vor.u32 %v3771_v9, %v3406_v7  ;;  %v2595_v62 = vor.u32 %v3564_v50, %v2592_v51  ;;  %v2376_v0 = vld [vmem:[#allocation5 + $0x28] sm:$0xf0]  ;;  %v2928_v7 = vld [vmem:[#allocation5 + $0x478] sm:$0xf0] }
  0xf2   :  { %2212 = vmatpush.bf16.msrb.mxu0 %v3311_v14  ;;  %2178 = vmatmul.bf16.vlgmr.msra.gmra.mxu1 %v3950_v6  ;;  %v2640_v14 = vld [vmem:[#allocation5 + $0x238] sm:$0xf0]  ;;  %v3630_v51 = vld [vmem:[#allocation5 + $0x3d4] sm:$0xf] }
  0xf3   :  { %2226 = vmatpush.bf16.msrb.mxu1 %v3503_v16  ;;  %2192 = vmatmul.bf16.vlgmr.msra.gmra.mxu2 %v3953_v22  ;;  %v3215_v16 = vor.u32 %v3723_v5, %v3214_v4  ;;  %v2643_v25 = vor.u32 %v3576_v13, %v2640_v14  ;;  %v3648_v5 = vld [vmem:[#allocation5 + $0x464] sm:$0xf]  ;;  %v3335_v14 = vor.u32 %v3753_v60, %v3334_v59  ;;  %v3774_v59 = vld [vmem:[#allocation5 + $0x854] sm:$0xf] }
  0xf4   :  { %2240 = vmatpush.bf16.msrb.mxu2 %v2547_v17  ;;  %2206 = vmatmul.bf16.vlgmr.msra.gmra.mxu3 %v3955_v23  ;;  %v3190_v17 = vld [vmem:[#allocation5 + $0x670] sm:$0xf] }
  0xf5   :  { %2254 = vmatpush.bf16.msrb.mxu3 %v2739_v21  ;;  %v3382_v21 = vld [vmem:[#allocation5 + $0x7f0] sm:$0xf]  ;;  %v3191_v37 = vor.u32 %v3717_v20, %v3190_v17  ;;  %v3792_v17 = vld [vmem:[#allocation5 + $0x8e4] sm:$0xf]  ;;  %v3642_v20 = vld [vmem:[#allocation5 + $0x434] sm:$0xf] }
  0xf6   :  { %2213 = vmatpush.bf16.msrb.mxu0 %v3287_v31  ;;  %v1969_v27 = vpop.f32.mrf.mxu2  ;;  %v1943_v31 = vpop.f32.mrf.mxu0  ;;  %v3383_v38 = vor.u32 %v3765_v24, %v3382_v21 }
  0xf7   :  { %2227 = vmatpush.bf16.msrb.mxu1 %v3479_v32  ;;  %v1970_v30 = vadd.f32 %v1969_v27, %v1956_v12  ;;  %v1983_v32 = vpop.f32.mrf.mxu3  ;;  %v3312_v12 = vld [vmem:[#allocation5 + $0x778] sm:$0xf0]  ;;  %v3690_v27 = vld [vmem:[#allocation5 + $0x5b4] sm:$0xf] }
  0xf8   :  { %2241 = vmatpush.bf16.msrb.mxu2 %v2523_v34  ;;  %v3570_v34 = vld [vmem:[#allocation5 + $0x1f4] sm:$0xf]  ;;  %v3315_v24 = vor.u32 %v3744_v11, %v3312_v12  ;;  %v2808_v12 = vld [vmem:[#allocation5 + $0x388] sm:$0xf0] }
  0xf9   :  { %2255 = vmatpush.bf16.msrb.mxu3 %v2715_v40  ;;  %v1944_v40 = vadd.f32 %v1943_v31, %v1930_v18  ;;  %v1984_v41 = vadd.f32 %v1983_v32, %v1970_v30  ;;  %v2619_v45 = vor.u32 %v3570_v34, %v2616_v36  ;;  %v3504_v18 = vld [vmem:[#allocation5 + $0x8f8] sm:$0xf0]  ;;  %v3738_v30 = vld [vmem:[#allocation5 + $0x734] sm:$0xf]  ;;  %v3288_v31 = vld [vmem:[#allocation5 + $0x748] sm:$0xf0] }
  0xfa   :  { %2214 = vmatpush.bf16.msrb.mxu0 %v3263_v46  ;;  %v1957_v46 = vpop.f32.mrf.mxu1  ;;  %v3507_v28 = vor.u32 %v3792_v17, %v3504_v18  ;;  %v3786_v32 = vld [vmem:[#allocation5 + $0x8b4] sm:$0xf]  ;;  %v3480_v34 = vld [vmem:[#allocation5 + $0x8c8] sm:$0xf0] }
  0xfb   :  { %2228 = vmatpush.bf16.msrb.mxu1 %v3455_v48  ;;  %v3516_v48 = vld [vmem:[#allocation5 + $0x44] sm:$0xf]  ;;  %2325 = vst [vmem:[#allocation8 + $0x8] sm:$0xff] %v1984_v41  ;;  %v1958_v55 = vadd.f32 %v1957_v46, %v1944_v40  ;;  %v2880_v41 = vld [vmem:[#allocation5 + $0x418] sm:$0xf0]  ;;  %v3483_v43 = vor.u32 %v3786_v32, %v3480_v34 }
  0xfc   :  { %2242 = vmatpush.bf16.msrb.mxu2 %v2499_v49  ;;  %v2400_v49 = vld [vmem:[#allocation5 + $0x58] sm:$0xf0]  ;;  %v3636_v40 = vld [vmem:[#allocation5 + $0x404] sm:$0xf]  ;;  %v3618_v11 = vld [vmem:[#allocation5 + $0x374] sm:$0xf] }
  0xfd   :  { %2256 = vmatpush.bf16.msrb.mxu3 %v2691_v54  ;;  %v3705_v54 = vld [vmem:[#allocation5 + $0x624] sm:$0xf0]  ;;  %v2403_v58 = vor.u32 %v3516_v48, %v2400_v49  ;;  %v3780_v46 = vld [vmem:[#allocation5 + $0x884] sm:$0xf]  ;;  %v2883_v48 = vor.u32 %v3636_v40, %v2880_v41  ;;  %v3714_v17 = vld [vmem:[#allocation5 + $0x674] sm:$0xf] }
  0xfe   :  { %2215 = vmatpush.bf16.msrb.mxu0 %v3239_v63  ;;  %v1971_v63 = vpop.f32.mrf.mxu2  ;;  %v3143_v9 = vor.u32 %v3705_v54, %v3142_v53  ;;  %v3678_v53 = vld [vmem:[#allocation5 + $0x554] sm:$0xf]  ;;  %v3459_v54 = vor.u32 %v3780_v46, %v3456_v47  ;;  %v3192_v18 = vld [vmem:[#allocation5 + $0x688] sm:$0xf0]  ;;  %v2976_v32 = vld [vmem:[#allocation5 + $0x4d8] sm:$0xf0] }
  0xff   :  { %2229 = vmatpush.bf16.msrb.mxu1 %v3431_v2  ;;  %v2568_v2 = vld [vmem:[#allocation5 + $0x1a8] sm:$0xf0]  ;;  %v1985_v4 = vpop.f32.mrf.mxu3  ;;  %v3708_v34 = vld [vmem:[#allocation5 + $0x644] sm:$0xf]  ;;  %v3360_v40 = vld [vmem:[#allocation5 + $0x7d8] sm:$0xf0] }
 0x100   :  { %2243 = vmatpush.bf16.msrb.mxu2 %v2475_v3  ;;  %v1972_v3 = vadd.f32 %v1971_v63, %v1958_v55  ;;  %v3048_v55 = vld [vmem:[#allocation5 + $0x568] sm:$0xf0]  ;;  %v2832_v63 = vld [vmem:[#allocation5 + $0x3b8] sm:$0xf0] }
 0x101   :  { %2257 = vmatpush.bf16.msrb.mxu3 %v2667_v8  ;;  %v3696_v8 = vld [vmem:[#allocation5 + $0x5e4] sm:$0xf]  ;;  %v2952_v47 = vld [vmem:[#allocation5 + $0x4a8] sm:$0xf0] }
 0x102   :  { %2216 = vmatpush.bf16.msrb.mxu0 %v3215_v16  ;;  %v1986_v13 = vadd.f32 %v1985_v4, %v1972_v3  ;;  %v2379_v16 = vor.u32 %v3510_v61, %v2376_v0  ;;  %v3123_v21 = vor.u32 %v3696_v8, %v3120_v10  ;;  %v3051_v61 = vor.u32 %v3678_v53, %v3048_v55  ;;  %v3672_v0 = vld [vmem:[#allocation5 + $0x524] sm:$0xf]  ;;  %v3216_v4 = vld [vmem:[#allocation5 + $0x6b8] sm:$0xf0] }
 0x103   :  { %2230 = vmatpush.bf16.msrb.mxu1 %v3407_v15  ;;  %v2571_v15 = vor.u32 %v3558_v1, %v2568_v2  ;;  %v3024_v2 = vld [vmem:[#allocation5 + $0x538] sm:$0xf0]  ;;  %v3720_v3 = vld [vmem:[#allocation5 + $0x6a4] sm:$0xf] }
 0x104   :  { %2244 = vmatpush.bf16.msrb.mxu2 %v2451_v19  ;;  %v2931_v19 = vor.u32 %v3648_v5, %v2928_v7  ;;  %2331 = vst [vmem:[#allocation8 + $0x38] sm:$0xff] %v1986_v13  ;;  %v3768_v5 = vld [vmem:[#allocation5 + $0x824] sm:$0xf]  ;;  %v3408_v7 = vld [vmem:[#allocation5 + $0x838] sm:$0xf0]  ;;  %v3219_v10 = vor.u32 %v3720_v3, %v3216_v4 }
 0x105   :  { %2258 = vmatpush.bf16.msrb.mxu3 %v2643_v25  ;;  %v2904_v25 = vld [vmem:[#allocation5 + $0x448] sm:$0xf0]  ;;  %v3666_v13 = vld [vmem:[#allocation5 + $0x4f4] sm:$0xf] }
 0x106   :  { %2217 = vmatpush.bf16.msrb.mxu0 %v3191_v37  ;;  %v2907_v36 = vor.u32 %v3642_v20, %v2904_v25  ;;  %v3099_v37 = vor.u32 %v3690_v27, %v3096_v29  ;;  %v2811_v20 = vor.u32 %v3618_v11, %v2808_v12  ;;  %v3195_v25 = vor.u32 %v3714_v17, %v3192_v18  ;;  %v2784_v29 = vld [vmem:[#allocation5 + $0x358] sm:$0xf0]  ;;  %v4008_v12 = vld [vmem:[#allocation7] sm:$0x3f] }
 0x107   :  { %2231 = vmatpush.bf16.msrb.mxu1 %v3383_v38  ;;  %v3291_v38 = vor.u32 %v3738_v30, %v3288_v31  ;;  %v3660_v30 = vld [vmem:[#allocation5 + $0x4c4] sm:$0xf] }
 0x108   :  { %2245 = vmatpush.bf16.msrb.mxu2 %v2427_v42  ;;  %v3684_v42 = vld [vmem:[#allocation5 + $0x584] sm:$0xf] }
 0x109   :  { %2259 = vmatpush.bf16.msrb.mxu3 %v2619_v45  ;;  %v3264_v45 = vld [vmem:[#allocation5 + $0x718] sm:$0xf0]  ;;  %v3075_v49 = vor.u32 %v3684_v42, %v3072_v33  ;;  %v2760_v33 = vld [vmem:[#allocation5 + $0x328] sm:$0xf0] }
 0x10a   :  { %2218 = vmatpush.bf16.msrb.mxu0 %v3167_v52  ;;  %v3267_v50 = vor.u32 %v3732_v44, %v3264_v45  ;;  %v2856_v52 = vld [vmem:[#allocation5 + $0x3e8] sm:$0xf0]  ;;  %v3654_v44 = vld [vmem:[#allocation5 + $0x494] sm:$0xf] }
 0x10b   :  { %2232 = vmatpush.bf16.msrb.mxu1 %v3359_v56  ;;  %v3726_v56 = vld [vmem:[#allocation5 + $0x6d4] sm:$0xf]  ;;  %v2859_v60 = vor.u32 %v3630_v51, %v2856_v52  ;;  %v3336_v51 = vld [vmem:[#allocation5 + $0x7a8] sm:$0xf0]  ;;  %v2955_v53 = vor.u32 %v3654_v44, %v2952_v47 }
 0x10c   :  { %2246 = vmatpush.bf16.msrb.mxu2 %v2403_v58  ;;  %v3240_v58 = vld [vmem:[#allocation5 + $0x6e8] sm:$0xf0] }
 0x10d   :  { %2260 = vmatpush.bf16.msrb.mxu3 %v2595_v62  ;;  %v3624_v62 = vld [vmem:[#allocation5 + $0x3a4] sm:$0xf] }
 0x10e   :  { %2219 = vmatpush.bf16.msrb.mxu0 %v3143_v9  ;;  %v2835_v8 = vor.u32 %v3624_v62, %v2832_v63  ;;  %v3027_v9 = vor.u32 %v3672_v0, %v3024_v2  ;;  %v1997_v27 = vpop.f32.mrf.mxu0 }
 0x10f   :  { %2233 = vmatpush.bf16.msrb.mxu1 %v3335_v14  ;;  %v3411_v14 = vor.u32 %v3768_v5, %v3408_v7 }
 0x110   :  { %2247 = vmatpush.bf16.msrb.mxu2 %v2379_v16  ;;  %v3000_v16 = vld [vmem:[#allocation5 + $0x508] sm:$0xf0] }
 0x111   :  { %2261 = vmatpush.bf16.msrb.mxu3 %v2571_v15  ;;  %2220 = vmatmul.bf16.vlgmr.msrb.gmra.mxu0 %v3959_v35  ;;  %v3762_v15 = vld [vmem:[#allocation5 + $0x7f4] sm:$0xf] }
 0x112   :  { %2268 = vmatpush.bf16.msra.mxu0 %v2931_v19  ;;  %2234 = vmatmul.bf16.vlgmr.msrb.gmra.mxu1 %v3961_v39  ;;  %v3384_v19 = vld [vmem:[#allocation5 + $0x808] sm:$0xf0] }
 0x113   :  { %2282 = vmatpush.bf16.msra.mxu1 %v3123_v21  ;;  %2248 = vmatmul.bf16.vlgmr.msrb.gmra.mxu2 %v3947_v57  ;;  %v3432_v57 = vld [vmem:[#allocation5 + $0x868] sm:$0xf0]  ;;  %v370_v21 = vperm.slane %v3979_v26, 2  ;;  %v3387_v31 = vor.u32 %v3762_v15, %v3384_v19  ;;  %v2979_v26 = vor.u32 %v3660_v30, %v2976_v32 }
 0x114   :  { %2296 = vmatpush.bf16.msra.mxu2 %v3315_v24  ;;  %2262 = vmatmul.bf16.vlgmr.msrb.gmra.mxu3 %v3950_v6  ;;  %v3243_v6 = vor.u32 %v3726_v56, %v3240_v58  ;;  %v3435_v1 = vor.u32 %v3774_v59, %v3432_v57  ;;  %v3003_v24 = vor.u32 %v3666_v13, %v3000_v16 }
 0x115   :  { %2310 = vmatpush.bf16.msra.mxu3 %v3507_v28  ;;  %v3612_v28 = vld [vmem:[#allocation5 + $0x344] sm:$0xf]  ;;  %v1998_v45 = vadd.f32 %v1997_v27, %v370_v21 }
 0x116   :  { %2269 = vmatpush.bf16.msra.mxu0 %v2907_v36  ;;  %v3168_v36 = vld [vmem:[#allocation5 + $0x658] sm:$0xf0]  ;;  %v2787_v41 = vor.u32 %v3612_v28, %v2784_v29  ;;  %v2025_v55 = vpop.f32.mrf.mxu2  ;;  %v1999_v59 = vpop.f32.mrf.mxu0 }
 0x117   :  { %2283 = vmatpush.bf16.msra.mxu1 %v3099_v37  ;;  %v2011_v37 = vpop.f32.mrf.mxu1  ;;  %v3171_v42 = vor.u32 %v3708_v34, %v3168_v36 }
 0x118   :  { %2297 = vmatpush.bf16.msra.mxu2 %v3291_v38  ;;  %v3756_v38 = vld [vmem:[#allocation5 + $0x7c4] sm:$0xf]  ;;  %v2012_v56 = vadd.f32 %v2011_v37, %v1998_v45 }
 0x119   :  { %2311 = vmatpush.bf16.msra.mxu3 %v3483_v43  ;;  %v3606_v43 = vld [vmem:[#allocation5 + $0x314] sm:$0xf]  ;;  %v3363_v46 = vor.u32 %v3756_v38, %v3360_v40 }
 0x11a   :  { %2270 = vmatpush.bf16.msra.mxu0 %v2883_v48  ;;  %v3702_v48 = vld [vmem:[#allocation5 + $0x614] sm:$0xf]  ;;  %v2763_v52 = vor.u32 %v3606_v43, %v2760_v33 }
 0x11b   :  { %2284 = vmatpush.bf16.msra.mxu1 %v3075_v49  ;;  %v3144_v49 = vld [vmem:[#allocation5 + $0x628] sm:$0xf0] }
 0x11c   :  { %2298 = vmatpush.bf16.msra.mxu2 %v3267_v50  ;;  %v3750_v50 = vld [vmem:[#allocation5 + $0x794] sm:$0xf] }
 0x11d   :  { %2312 = vmatpush.bf16.msra.mxu3 %v3459_v54  ;;  %v3147_v54 = vor.u32 %v3702_v48, %v3144_v49  ;;  %v3339_v58 = vor.u32 %v3750_v50, %v3336_v51 }
 0x11e   :  { %2271 = vmatpush.bf16.msra.mxu0 %v2859_v60  ;;  %v2039_v60 = vpop.f32.mrf.mxu3  ;;  %v2027_v0 = vpop.f32.mrf.mxu2 }
 0x11f   :  { %2285 = vmatpush.bf16.msra.mxu1 %v3051_v61  ;;  %v2013_v57 = vpop.f32.mrf.mxu1  ;;  %v2000_v61 = vadd.f32 %v1999_v59, %v370_v21 }
 0x120   :  { %2299 = vmatpush.bf16.msra.mxu2 %v3243_v6  ;;  %v2026_v6 = vadd.f32 %v2025_v55, %v2012_v56 }
 0x121   :  { %2313 = vmatpush.bf16.msra.mxu3 %v3435_v1  ;;  %v2014_v62 = vadd.f32 %v2013_v57, %v2000_v61 }
 0x122   :  { %2272 = vmatpush.bf16.msra.mxu0 %v2835_v8  ;;  %v2040_v63 = vadd.f32 %v2039_v60, %v2026_v6 }
 0x123   :  { %2286 = vmatpush.bf16.msra.mxu1 %v3027_v9  ;;  %v2028_v4 = vadd.f32 %v2027_v0, %v2014_v62 }
 0x124   :  { %2300 = vmatpush.bf16.msra.mxu2 %v3219_v10 }
 0x125   :  { %2314 = vmatpush.bf16.msra.mxu3 %v3411_v14 }
 0x126   :  { %2273 = vmatpush.bf16.msra.mxu0 %v2811_v20  ;;  %v2041_v5 = vpop.f32.mrf.mxu3 }
 0x127   :  { %2287 = vmatpush.bf16.msra.mxu1 %v3003_v24  ;;  %v2042_v8 = vadd.f32 %v2041_v5, %v2028_v4 }
 0x128   :  { %2301 = vmatpush.bf16.msra.mxu2 %v3195_v25 }
 0x129   :  { %2315 = vmatpush.bf16.msra.mxu3 %v3387_v31 }
 0x12a   :  { %2274 = vmatpush.bf16.msra.mxu0 %v2787_v41 }
 0x12b   :  { %2288 = vmatpush.bf16.msra.mxu1 %v2979_v26  ;;  %v372_v26 = vperm.slane %v4008_v12, 4 }
 0x12c   :  { %2302 = vmatpush.bf16.msra.mxu2 %v3171_v42 }
 0x12d   :  { %2316 = vmatpush.bf16.msra.mxu3 %v3363_v46 }
 0x12e   :  { %2275 = vmatpush.bf16.msra.mxu0 %v2763_v52  ;;  %v2053_v1 = vpop.f32.mrf.mxu0 }
 0x12f   :  { %2289 = vmatpush.bf16.msra.mxu1 %v2955_v53  ;;  %v2054_v2 = vadd.f32 %v2053_v1, %v2040_v63  ;;  %v2067_v3 = vpop.f32.mrf.mxu1  ;;  %v373_v1 = vperm.slane %v4008_v12, 5 }
 0x130   :  { %2303 = vmatpush.bf16.msra.mxu2 %v3147_v54 }
 0x131   :  { %2317 = vmatpush.bf16.msra.mxu3 %v3339_v58  ;;  %2276 = vmatmul.bf16.vlgmr.msra.gmra.mxu0 %v3953_v22  ;;  %v2068_v7 = vadd.f32 %v2067_v3, %v2054_v2 }
 0x132   :  { %2290 = vmatmul.bf16.vlgmr.msra.gmra.mxu1 %v3955_v23 }
 0x133   :  { %2304 = vmatmul.bf16.vlgmr.msra.gmra.mxu2 %v3959_v35  ;;  %2326 = vst [vmem:[#allocation8 + $0x10] sm:$0xff] %v2068_v7 }
 0x134   :  { %2318 = vmatmul.bf16.vlgmr.msra.gmra.mxu3 %v3961_v39  ;;  %v371_v39 = vperm.slane %v4008_v12, 3 }
 0x136   :  { %v2055_v9 = vpop.f32.mrf.mxu0  ;;  %v2081_v23 = vpop.f32.mrf.mxu2 }
 0x137   :  { %v2056_v10 = vadd.f32 %v2055_v9, %v2042_v8  ;;  %v2069_v22 = vpop.f32.mrf.mxu1  ;;  %v2095_v35 = vpop.f32.mrf.mxu3  ;;  %v2082_v13 = vadd.f32 %v2081_v23, %v371_v39 }
 0x139   :  { %v2070_v11 = vadd.f32 %v2069_v22, %v2056_v10  ;;  %v2096_v14 = vadd.f32 %v2095_v35, %v2082_v13 }
 0x13b   :  { %2332 = vst [vmem:[#allocation8 + $0x40] sm:$0xff] %v2070_v11 }
 0x13e   :  { %v2083_v16 = vpop.f32.mrf.mxu2 }
 0x13f   :  { %v2097_v17 = vpop.f32.mrf.mxu3  ;;  %v2084_v20 = vadd.f32 %v2083_v16, %v371_v39 }
 0x141   :  { %v2098_v24 = vadd.f32 %v2097_v17, %v2084_v20 }
 0x14e   :  { %v2109_v18 = vpop.f32.mrf.mxu0 }
 0x14f   :  { %v2110_v15 = vadd.f32 %v2109_v18, %v2096_v14  ;;  %v2123_v19 = vpop.f32.mrf.mxu1 }
 0x151   :  { %v2124_v21 = vadd.f32 %v2123_v19, %v2110_v15 }
 0x156   :  { %v2137_v25 = vpop.f32.mrf.mxu2  ;;  %v2111_v28 = vpop.f32.mrf.mxu0 }
 0x157   :  { %v2138_v27 = vadd.f32 %v2137_v25, %v2124_v21  ;;  %v2151_v29 = vpop.f32.mrf.mxu3  ;;  %v2112_v30 = vadd.f32 %v2111_v28, %v2098_v24  ;;  %v2125_v32 = vpop.f32.mrf.mxu1 }
 0x159   :  { %v2152_v31 = vadd.f32 %v2151_v29, %v2138_v27  ;;  %v2126_v34 = vadd.f32 %v2125_v32, %v2112_v30 }
 0x15b   :  { %2327 = vst [vmem:[#allocation8 + $0x18] sm:$0xff] %v2152_v31 }
 0x15e   :  { %v2139_v36 = vpop.f32.mrf.mxu2 }
 0x15f   :  { %v2140_v37 = vadd.f32 %v2139_v36, %v2126_v34  ;;  %v2153_v38 = vpop.f32.mrf.mxu3 }
 0x161   :  { %v2154_v40 = vadd.f32 %v2153_v38, %v2140_v37 }
 0x163   :  { %2333 = vst [vmem:[#allocation8 + $0x48] sm:$0xff] %v2154_v40 }
 0x16e   :  { %v2165_v41 = vpop.f32.mrf.mxu0 }
 0x16f   :  { %v2179_v42 = vpop.f32.mrf.mxu1  ;;  %v2166_v43 = vadd.f32 %v2165_v41, %v372_v26 }
 0x171   :  { %v2180_v44 = vadd.f32 %v2179_v42, %v2166_v43 }
 0x176   :  { %v2193_v33 = vpop.f32.mrf.mxu2  ;;  %v2167_v45 = vpop.f32.mrf.mxu0 }
 0x177   :  { %v2181_v46 = vpop.f32.mrf.mxu1  ;;  %v2207_v47 = vpop.f32.mrf.mxu3  ;;  %v2168_v48 = vadd.f32 %v2167_v45, %v372_v26  ;;  %v2194_v49 = vadd.f32 %v2193_v33, %v2180_v44 }
 0x179   :  { %v2182_v50 = vadd.f32 %v2181_v46, %v2168_v48  ;;  %v2208_v51 = vadd.f32 %v2207_v47, %v2194_v49 }
 0x17e   :  { %v2195_v52 = vpop.f32.mrf.mxu2 }
 0x17f   :  { %v2196_v56 = vadd.f32 %v2195_v52, %v2182_v50  ;;  %v2209_v58 = vpop.f32.mrf.mxu3 }
 0x181   :  { %v2210_v57 = vadd.f32 %v2209_v58, %v2196_v56 }
 0x18e   :  { %v2221_v53 = vpop.f32.mrf.mxu0 }
 0x18f   :  { %v2222_v54 = vadd.f32 %v2221_v53, %v2208_v51  ;;  %v2235_v55 = vpop.f32.mrf.mxu1 }
 0x191   :  { %v2236_v59 = vadd.f32 %v2235_v55, %v2222_v54 }
 0x193   :  { %2328 = vst [vmem:[#allocation8 + $0x20] sm:$0xff] %v2236_v59 }
 0x196   :  { %v2223_v60 = vpop.f32.mrf.mxu0  ;;  %v2249_v63 = vpop.f32.mrf.mxu2 }
 0x197   :  { %v2224_v61 = vadd.f32 %v2223_v60, %v2210_v57  ;;  %v2237_v6 = vpop.f32.mrf.mxu1  ;;  %v2263_v0 = vpop.f32.mrf.mxu3  ;;  %v2250_v2 = vadd.f32 %v2249_v63, %v373_v1 }
 0x199   :  { %v2238_v62 = vadd.f32 %v2237_v6, %v2224_v61  ;;  %v2264_v4 = vadd.f32 %v2263_v0, %v2250_v2 }
 0x19b   :  { %2334 = vst [vmem:[#allocation8 + $0x50] sm:$0xff] %v2238_v62 }
 0x19e   :  { %v2251_v3 = vpop.f32.mrf.mxu2 }
 0x19f   :  { %v2265_v5 = vpop.f32.mrf.mxu3  ;;  %v2252_v10 = vadd.f32 %v2251_v3, %v373_v1 }
 0x1a1   :  { %v2266_v23 = vadd.f32 %v2265_v5, %v2252_v10 }
 0x1ae   :  { %v2277_v7 = vpop.f32.mrf.mxu0 }
 0x1af   :  { %v2278_v8 = vadd.f32 %v2277_v7, %v2264_v4  ;;  %v2291_v9 = vpop.f32.mrf.mxu1 }
 0x1b1   :  { %v2292_v22 = vadd.f32 %v2291_v9, %v2278_v8 }
 0x1b6   :  { %v2305_v11 = vpop.f32.mrf.mxu2  ;;  %v2279_v13 = vpop.f32.mrf.mxu0 }
 0x1b7   :  { %v2306_v35 = vadd.f32 %v2305_v11, %v2292_v22  ;;  %v2319_v39 = vpop.f32.mrf.mxu3  ;;  %v2280_v16 = vadd.f32 %v2279_v13, %v2266_v23  ;;  %v2293_v17 = vpop.f32.mrf.mxu1 }
 0x1b9   :  { %v2320_v14 = vadd.f32 %v2319_v39, %v2306_v35  ;;  %v2294_v18 = vadd.f32 %v2293_v17, %v2280_v16 }
 0x1bb   :  { %2329 = vst [vmem:[#allocation8 + $0x28] sm:$0xff] %v2320_v14 }
 0x1be   :  { %v2307_v12 = vpop.f32.mrf.mxu2 }
 0x1bf   :  { %v2308_v15 = vadd.f32 %v2307_v12, %v2294_v18  ;;  %v2321_v19 = vpop.f32.mrf.mxu3 }
 0x1c1   :  { %v2322_v20 = vadd.f32 %v2321_v19, %v2308_v15 }
 0x1c3   :  { %2335 = vst [vmem:[#allocation8 + $0x58] sm:$0xff] %v2322_v20 }
 0x1c4   :  { %2348 = dma.vmem_to_hbm [thread:$0]  %s2341_s29, 1536, %s2343_s5, [#allocation4], %s3911_s24, %s3911_s24, %s3912_s25  }
 0x1c5   :  { %3905 = dma.done.wait [#allocation4], 1536  }
 0x1c6   :  { %3906 = vsyncadd [#allocation4], 4294965760 }
 0x1c7   :  { %2353 = vsyncpa [#allocation3], 1 }
 0x1c8   :  { %2354 = vsyncpa [#allocation6], 1 }
 0x1c9   :  { %2355 = vsyncpa [#allocation4], 1 }

</bundles_post_ra>
